<compile_context>
chip_gen: v7x
topology: tpu7x:2x2x1
jax: 0.10.0
libtpu: 0.0.40
codegen_flags: <defaults>
</compile_context>

<pallas_src>
import functools

import jax
import jax.numpy as jnp
from jax.experimental import pallas as pl
from jax.experimental.pallas import tpu as pltpu


def _llama_hidden_dim(dim: int, hidden_dim: int, multiple_of: int,
                      ffn_dim_multiplier=None) -> int:
    """Replicates the hidden-dim rounding logic in FeedForward.__init__."""
    hidden_dim = int(2 * hidden_dim / 3)
    if ffn_dim_multiplier is not None:
        hidden_dim = int(ffn_dim_multiplier * hidden_dim)
    hidden_dim = multiple_of * ((hidden_dim + multiple_of - 1) // multiple_of)
    return hidden_dim


def prepare_weights(w1, w2, w3, *, lane_multiple=128, compute_dtype=jnp.bfloat16):
    """One-time weight prep (call at model load, NOT per forward).

    w1, w3: (hidden, dim)  nn.Linear layout (out_features, in_features)
    w2:     (dim, hidden)

    Returns:
      w13: (2, dim, hidden_p)  -- stacked [W1^T, W3^T], hidden zero-padded to a
                                  multiple of `lane_multiple`, cast to bf16.
      w2t: (hidden_p, dim)     -- W2^T with zero-padded rows, cast to bf16.
    Padded hidden columns contribute exactly zero (silu(0)*0 == 0 and the
    corresponding W2^T rows are zero).
    """
    hidden, dim = w1.shape
    hidden_p = lane_multiple * ((hidden + lane_multiple - 1) // lane_multiple)
    pad = hidden_p - hidden
    w1t = jnp.pad(w1.T, ((0, 0), (0, pad)))          # (dim, hidden_p)
    w3t = jnp.pad(w3.T, ((0, 0), (0, pad)))          # (dim, hidden_p)
    w2t = jnp.pad(w2.T, ((0, pad), (0, 0)))          # (hidden_p, dim)
    w13 = jnp.stack([w1t, w3t], axis=0)              # (2, dim, hidden_p)
    return w13.astype(compute_dtype), w2t.astype(compute_dtype)


# ---------------------------------------------------------------------------
# Kernels
# ---------------------------------------------------------------------------

def _ffn_kernel_scratch(x_ref, w13_ref, w2t_ref, o_ref, acc_ref):
    """Variant with a separate f32 accumulator (non-f32 output dtypes)."""
    h = pl.program_id(1)

    @pl.when(h == 0)
    def _():
        acc_ref[...] = jnp.zeros_like(acc_ref)

    cdt = w13_ref.dtype
    x = x_ref[...].astype(cdt)                        # in-kernel cast to bf16
    h1 = jnp.dot(x, w13_ref[0], preferred_element_type=jnp.float32)
    h3 = jnp.dot(x, w13_ref[1], preferred_element_type=jnp.float32)
    gated = (h1 * jax.nn.sigmoid(h1)) * h3            # silu(xW1^T) * (xW3^T), f32
    acc_ref[...] += jnp.dot(gated.astype(cdt), w2t_ref[...],
                            preferred_element_type=jnp.float32)

    @pl.when(h == pl.num_programs(1) - 1)
    def _():
        o_ref[...] = acc_ref[...].astype(o_ref.dtype)


def _ffn_kernel_accum_out(x_ref, w13_ref, w2t_ref, o_ref):
    """Variant accumulating directly into the resident f32 output block."""
    h = pl.program_id(1)

    @pl.when(h == 0)
    def _():
        o_ref[...] = jnp.zeros_like(o_ref)

    cdt = w13_ref.dtype
    x = x_ref[...].astype(cdt)
    h1 = jnp.dot(x, w13_ref[0], preferred_element_type=jnp.float32)
    h3 = jnp.dot(x, w13_ref[1], preferred_element_type=jnp.float32)
    gated = (h1 * jax.nn.sigmoid(h1)) * h3
    o_ref[...] += jnp.dot(gated.astype(cdt), w2t_ref[...],
                          preferred_element_type=jnp.float32)


# ---------------------------------------------------------------------------
# Tile / budget selection helpers
# ---------------------------------------------------------------------------

def _vmem_capacity_bytes() -> int:
    try:
        return int(pltpu.get_tpu_info().vmem_capacity_bytes)
    except Exception:
        return 128 << 20   # conservative default (v5e/v6e)


def _largest_divisor_tile(total: int, target: int, granule: int) -> int:
    """Largest multiple of `granule` that divides `total` and is <= target.

    Falls back to `total` (full extent always satisfies the layout rules).
    """
    cap = min(target, total)
    t = (cap // granule) * granule
    while t >= granule:
        if total % t == 0:
            return t
        t -= granule
    return total


def _working_set_bytes(tm, th, dim, x_itemsize, w_itemsize, out_itemsize,
                       use_scratch):
    x_tile = tm * dim * x_itemsize
    w13_tile = 2 * dim * th * w_itemsize
    w2_tile = th * dim * w_itemsize
    out_tile = tm * dim * out_itemsize
    acc = tm * dim * 4 if use_scratch else 0
    # h1, h3, gated (f32) + gated cast to compute dtype.
    interm = tm * th * (4 + 4 + 4 + w_itemsize)
    headroom = 4 << 20   # Mosaic internal scratch etc.
    return 2 * (x_tile + w13_tile + w2_tile) + out_tile + acc + interm + headroom


# ---------------------------------------------------------------------------
# Forward
# ---------------------------------------------------------------------------

@functools.partial(jax.jit,
                   static_argnames=("tm", "th", "vmem_limit", "use_scratch"))
def _feed_forward_impl(x, w13, w2t, *, tm, th, vmem_limit, use_scratch):
    batch, seq, dim = x.shape
    hidden_p = w13.shape[-1]
    tokens = batch * seq
    x2d = x.reshape(tokens, dim)                      # no dtype cast on host

    grid = (tokens // tm, hidden_p // th)             # reduction axis last
    n_token_tiles = grid[0]

    w_itemsize = jnp.dtype(w13.dtype).itemsize
    out_itemsize = jnp.dtype(x.dtype).itemsize
    cost = pl.CostEstimate(
        flops=2 * tokens * dim * hidden_p * 3,
        transcendentals=tokens * hidden_p,
        bytes_accessed=(x2d.size * x2d.dtype.itemsize                # x read once
                        + tokens * dim * out_itemsize                # output write
                        + (w13.size + w2t.size) * w_itemsize * n_token_tiles),
    )

    kernel = _ffn_kernel_scratch if use_scratch else _ffn_kernel_accum_out
    scratch_shapes = ([pltpu.VMEM((tm, dim), jnp.float32)]
                      if use_scratch else [])

    out2d = pl.pallas_call(
        kernel,
        out_shape=jax.ShapeDtypeStruct((tokens, dim), x.dtype),
        grid_spec=pltpu.PrefetchScalarGridSpec(
            num_scalar_prefetch=0,
            grid=grid,
            in_specs=[
                pl.BlockSpec((tm, dim), lambda i, h: (i, 0)),        # x tile
                pl.BlockSpec((2, dim, th), lambda i, h: (0, 0, h)),  # W1^T/W3^T tile
                pl.BlockSpec((th, dim), lambda i, h: (h, 0)),        # W2^T tile
            ],
            out_specs=pl.BlockSpec((tm, dim), lambda i, h: (i, 0)),
            scratch_shapes=scratch_shapes,
        ),
        compiler_params=pltpu.CompilerParams(
            dimension_semantics=("parallel", "arbitrary"),
            vmem_limit_bytes=vmem_limit),
        cost_estimate=cost,
    )(x2d, w13, w2t)

    return out2d.reshape(batch, seq, dim)


def feed_forward(x, w13, w2t, *, tm=None, th=None):
    """x: (batch, seq, dim).  w13: (2, dim, hidden_p).  w2t: (hidden_p, dim).

    Weights must come from prepare_weights (stacked, pre-transposed,
    lane-padded, bf16).  tm/th default to generation-aware choices.
    """
    batch, seq, dim = x.shape
    assert w13.ndim == 3 and w13.shape[0] == 2 and w13.shape[1] == dim
    hidden_p = w13.shape[-1]
    assert w2t.shape == (hidden_p, dim)
    assert dim % 128 == 0, "dim must be lane-dense (multiple of 128)"
    assert hidden_p % 128 == 0, "hidden must be lane-padded (prepare_weights)"

    tokens = batch * seq
    vmem_cap = _vmem_capacity_bytes()
    vmem_budget = int(0.85 * vmem_cap)
    small_vmem = vmem_cap <= (64 << 20)               # e.g. v7x per-TC VMEM
    tm_target = 256 if small_vmem else 512
    th_target = 512 if small_vmem else 1024

    x_itemsize = jnp.dtype(x.dtype).itemsize
    w_itemsize = jnp.dtype(w13.dtype).itemsize
    out_itemsize = x_itemsize
    use_scratch = jnp.dtype(x.dtype) != jnp.dtype(jnp.float32)

    if tm is None:
        # Cap at tokens//2 so the "parallel" token axis has >=2 blocks
        # (keeps both v7x TensorCores busy).
        tm = _largest_divisor_tile(tokens, min(tm_target, max(tokens // 2, 16)), 16)
    if th is None:
        th = _largest_divisor_tile(hidden_p, th_target, 128)

    assert tokens % tm == 0, "token count must be divisible by the token tile"
    assert hidden_p % th == 0 and th % 128 == 0, "hidden tile must be lane-dense"

    # Shrink tiles until the double-buffered working set fits the VMEM budget.
    def need(tm_, th_):
        return _working_set_bytes(tm_, th_, dim, x_itemsize, w_itemsize,
                                  out_itemsize, use_scratch)

    while need(tm, th) > vmem_budget:
        if th > 128:
            th = _largest_divisor_tile(hidden_p, th // 2, 128)
            continue
        cand = _largest_divisor_tile(tokens, tm // 2, 16)
        if cand >= tm:
            break
        tm = cand

    vmem_limit = int(min(need(tm, th), vmem_budget))

    return _feed_forward_impl(x, w13, w2t, tm=tm, th=th,
                              vmem_limit=vmem_limit, use_scratch=use_scratch)


def _reference(x, w1, w2, w3):
    """Pure-JAX f32 reference matching the PyTorch module."""
    h1 = jnp.einsum("bsd,hd->bsh", x, w1)
    h3 = jnp.einsum("bsd,hd->bsh", x, w3)
    g = h1 * jax.nn.sigmoid(h1)
    return jnp.einsum("bsh,dh->bsd", g * h3, w2)


if __name__ == "__main__":
    # TODO(synk): ColumnParallelLinear / RowParallelLinear tensor-parallel
    # sharding is not modeled; weights are treated as plain dense linears.
    # Module config (small but lane-friendly): dim=128, hidden_dim=4*dim,
    # multiple_of=32, ffn_dim_multiplier=None  ->  hidden = 352 (padded to 384).
    dim = 128
    hidden = _llama_hidden_dim(dim, 4 * dim, multiple_of=32,
                               ffn_dim_multiplier=None)  # 352

    batch, seq = 2, 128   # tokens = 256 -> two token tiles on the parallel axis

    key = jax.random.PRNGKey(0)
    kx, k1, k2, k3 = jax.random.split(key, 4)
    x = jax.random.normal(kx, (batch, seq, dim), dtype=jnp.float32)
    # nn.Linear weight layout is (out_features, in_features), no bias.
    w1 = jax.random.normal(k1, (hidden, dim), dtype=jnp.float32) * 0.02
    w2 = jax.random.normal(k2, (dim, hidden), dtype=jnp.float32) * 0.02
    w3 = jax.random.normal(k3, (hidden, dim), dtype=jnp.float32) * 0.02

    # One-time weight prep (transpose + stack + lane-pad + bf16), off hot path.
    w13, w2t = prepare_weights(w1, w2, w3)

    out = feed_forward(x, w13, w2t)   # generation-aware default tiles
    out = jax.block_until_ready(out)

    ref = _reference(x, w1, w2, w3)
    assert out.shape == (batch, seq, dim)
    err = float(jnp.max(jnp.abs(out.astype(jnp.float32) - ref)))
    scale = float(jnp.max(jnp.abs(ref))) + 1e-6
    assert err <= 0.05 * scale, f"mismatch vs reference: max_err={err}, scale={scale}"

    print("KERNEL_OK")
</pallas_src>

<mosaic_0001>
module attributes {stable_mosaic.version = 11 : i64} {
  func.func @_ffn_kernel_accum_out(%arg0: i32, %arg1: i32, %arg2: memref<128x128xf32, #tpu.memory_space<vmem>>, %arg3: memref<2x128x384xbf16, #tpu.memory_space<vmem>>, %arg4: memref<384x128xbf16, #tpu.memory_space<vmem>>, %arg5: memref<128x128xf32, #tpu.memory_space<vmem>>) attributes {dimension_semantics = [#tpu.dimension_semantics<parallel>, #tpu.dimension_semantics<arbitrary>], iteration_bounds = array<i64: 2, 1>, scalar_prefetch = 0 : i64, scratch_operands = 0 : i64, tpu.core_type = #tpu.core_type<tc>, window_params = [{transform_indices = @transform_0, window_bounds = array<i64: 128, 128>}, {transform_indices = @transform_1, window_bounds = array<i64: 2, 128, 384>}, {transform_indices = @transform_2, window_bounds = array<i64: 384, 128>}, {transform_indices = @transform_3, window_bounds = array<i64: 128, 128>}]} {
    %c0_i32 = arith.constant 0 : i32
    %0 = arith.cmpi eq, %arg1, %c0_i32 : i32
    %1 = arith.extui %0 : i1 to i32
    %c0_i32_0 = arith.constant 0 : i32
    %2 = arith.cmpi ne, %1, %c0_i32_0 : i32
    scf.if %2 {
      %cst_16 = arith.constant 0.000000e+00 : f32
      %24 = vector.broadcast %cst_16 : f32 to vector<128x128xf32>
      %c0_17 = arith.constant 0 : index
      %c0_18 = arith.constant 0 : index
      %25 = vector.load %arg5[%c0_17, %c0_18] : memref<128x128xf32, #tpu.memory_space<vmem>>, vector<128x128xf32>
      tpu.vector_store %arg5[%c0_17, %c0_18], %24 {strides = array<i32>} : memref<128x128xf32, #tpu.memory_space<vmem>>, vector<128x128xf32>,
    } else {
    }
    %c0 = arith.constant 0 : index
    %c0_1 = arith.constant 0 : index
    %3 = vector.load %arg2[%c0, %c0_1] : memref<128x128xf32, #tpu.memory_space<vmem>>, vector<128x128xf32>
    %4 = arith.truncf %3 : vector<128x128xf32> to vector<128x128xbf16>
    %c0_2 = arith.constant 0 : index
    %c0_3 = arith.constant 0 : index
    %c0_4 = arith.constant 0 : index
    %5 = vector.load %arg3[%c0_2, %c0_3, %c0_4] : memref<2x128x384xbf16, #tpu.memory_space<vmem>>, vector<1x128x384xbf16>
    %6 = vector.shape_cast %5 : vector<1x128x384xbf16> to vector<128x384xbf16>
    %cst = arith.constant dense<0.000000e+00> : vector<128x384xf32>
    %7 = tpu.matmul %4, %6, %cst {dimension_numbers = #tpu.dot_dimension_numbers<[1], [0], [0], [1], [0, 0, 1, 1], [], []>} : vector<128x128xbf16>, vector<128x384xbf16>, vector<128x384xf32> -> vector<128x384xf32>
    %c1 = arith.constant 1 : index
    %c0_5 = arith.constant 0 : index
    %c0_6 = arith.constant 0 : index
    %8 = vector.load %arg3[%c1, %c0_5, %c0_6] : memref<2x128x384xbf16, #tpu.memory_space<vmem>>, vector<1x128x384xbf16>
    %9 = vector.shape_cast %8 : vector<1x128x384xbf16> to vector<128x384xbf16>
    %cst_7 = arith.constant dense<0.000000e+00> : vector<128x384xf32>
    %10 = tpu.matmul %4, %9, %cst_7 {dimension_numbers = #tpu.dot_dimension_numbers<[1], [0], [0], [1], [0, 0, 1, 1], [], []>} : vector<128x128xbf16>, vector<128x384xbf16>, vector<128x384xf32> -> vector<128x384xf32>
    %11 = arith.negf %7 : vector<128x384xf32>
    %12 = math.exp %11 : vector<128x384xf32>
    %cst_8 = arith.constant 1.000000e+00 : f32
    %13 = vector.broadcast %cst_8 : f32 to vector<128x384xf32>
    %14 = arith.addf %13, %12 : vector<128x384xf32>
    %15 = arith.divf %13, %14 : vector<128x384xf32>
    %16 = arith.mulf %7, %15 : vector<128x384xf32>
    %17 = arith.mulf %16, %10 : vector<128x384xf32>
    %c0_9 = arith.constant 0 : index
    %c0_10 = arith.constant 0 : index
    %18 = vector.load %arg5[%c0_9, %c0_10] : memref<128x128xf32, #tpu.memory_space<vmem>>, vector<128x128xf32>
    %19 = arith.truncf %17 : vector<128x384xf32> to vector<128x384xbf16>
    %c0_11 = arith.constant 0 : index
    %c0_12 = arith.constant 0 : index
    %20 = vector.load %arg4[%c0_11, %c0_12] : memref<384x128xbf16, #tpu.memory_space<vmem>>, vector<384x128xbf16>
    %cst_13 = arith.constant dense<0.000000e+00> : vector<128x128xf32>
    %21 = tpu.matmul %19, %20, %cst_13 {dimension_numbers = #tpu.dot_dimension_numbers<[1], [0], [0], [1], [0, 0, 1, 1], [], []>} : vector<128x384xbf16>, vector<384x128xbf16>, vector<128x128xf32> -> vector<128x128xf32>
    %22 = arith.addf %18, %21 : vector<128x128xf32>
    %c0_14 = arith.constant 0 : index
    %c0_15 = arith.constant 0 : index
    %23 = vector.load %arg5[%c0_14, %c0_15] : memref<128x128xf32, #tpu.memory_space<vmem>>, vector<128x128xf32>
    tpu.vector_store %arg5[%c0_14, %c0_15], %22 {strides = array<i32>} : memref<128x128xf32, #tpu.memory_space<vmem>>, vector<128x128xf32>,
    return
  }
  func.func @transform_0(%arg0: i32, %arg1: i32) -> (i32, i32) {
    %c0_i32 = arith.constant 0 : i32
    %c0_i32_0 = arith.constant 0 : i32
    return %arg0, %c0_i32 : i32, i32
  }
  func.func @transform_1(%arg0: i32, %arg1: i32) -> (i32, i32, i32) {
    %c0_i32 = arith.constant 0 : i32
    %c0_i32_0 = arith.constant 0 : i32
    %c0_i32_1 = arith.constant 0 : i32
    return %c0_i32, %c0_i32_0, %arg1 : i32, i32, i32
  }
  func.func @transform_2(%arg0: i32, %arg1: i32) -> (i32, i32) {
    %c0_i32 = arith.constant 0 : i32
    %c0_i32_0 = arith.constant 0 : i32
    return %arg1, %c0_i32 : i32, i32
  }
  func.func @transform_3(%arg0: i32, %arg1: i32) -> (i32, i32) {
    %c0_i32 = arith.constant 0 : i32
    %c0_i32_0 = arith.constant 0 : i32
    return %arg0, %c0_i32 : i32, i32
  }
}

</mosaic_0001>

<bundles_post_ra>
// kernel: _feed_forward_impl.1
= control target key start
LH: loop header
LB: loop body
LE: loop exit
PB: predicated region body
PF: predicated region fallthrough
CT: control target
= control target key end

     0   :  { %8 = vsyncpa [#allocation3], 0  ;;  %s3588_s0 = inlined_call_operand.hbm [shape: f32[256,128], index: 0, kind: input, shape index: {}]   ;;  %s3589_s1 = inlined_call_operand.hbm [shape: bf16[2,128,384], index: 1, kind: input, shape index: {}]   ;;  %s3590_s2 = inlined_call_operand.hbm [shape: bf16[384,128], index: 2, kind: input, shape index: {}]   ;;  %s3591_s3 = inlined_call_operand.hbm [shape: f32[256,128], index: 3, kind: output, shape index: {}]  }
   0x1   :  { %10 = vsyncpa [#allocation3 + $0x1], 0 }
   0x2   :  { %11 = vsyncpa [#allocation6], 0 }
   0x3   :  { %12 = vsyncpa [#allocation4], 0 }
   0x4   :  { %14 = vsyncpa [#allocation4 + $0x1], 0  ;;  %s2925_s12 = smov 0   ;;  %s2927_s13 = smov 0  }
   0x5   :  { %s2929_s14 = smov 0   ;;  %s2931_s15 = smov 0  }
   0x6   :  { %s2933_s16 = smov 0   ;;  %s2935_s17 = smov 0  }
   0x7 LB: > { %s1996_s18 = sadd.s32 4294967295, %s2890_s17   ;;  %s1997_s19 = sadd.s32 4294967294, %s2890_s17   ;;  %s2890_s17 = sphi %s2935_s17, %s20_s17   ;;  %s2886_s16 = sphi %s2933_s16, %s3644_s16   ;;  %s2882_s15 = sphi %s2931_s15, %s3643_s15   ;;  %s2878_s14 = sphi %s2929_s14, %s3642_s14   ;;  %s2874_s13 = sphi %s2927_s13, %s3641_s13   ;;  %s2870_s12 = sphi %s2925_s12, %s3640_s12  }
   0x8   : > { %p52_p0 = scmp.ne.s32.totalorder %s2874_s13, %s2870_s12  ;;  %p2959_p1 = scmp.eq.s32.totalorder %s1996_s18, 0 }
   0x9   : > { %p2963_p2 = scmp.eq.s32.totalorder %s1996_s18, 1  ;;  %p134_p3 = scmp.eq.s32.totalorder %s1997_s19, 1 }
   0xa   : > { %s3606_s20 = scalar_select %p2959_p1, 1, 0 }
   0xb   : > { %p2969_p4 = por %p2959_p1, %p52_p0  ;;  %p1998_p5 = scmp.ge.s32.totalorder %s2890_s17, 1 }
   0xc   : > { %p2974_p6 = por %p134_p3, %p52_p0  ;;  %p141_p7 = scmp.lt.s32.totalorder %s2890_s17, 3 }
   0xd   : > { %s3608_s22 = scalar_select %p2969_p4, 1, 0 }
   0xe   : > { %s3609_s23 = scalar_select %p2974_p6, 1, 0 }
   0xf   : > { %p2979_p8 = pnand %p1998_p5, %p141_p7  ;;  %s2892_s25 = smov [#allocation5]  }
  0x10   : > { %s156_s26 = sshll.u32 %s2892_s25, 4  ;;  %s2893_s28 = smov [#allocation7]   ;;  %s2983_s26 = int_to_ptr.vmem [resolvable:$true] %s156_s26 }
  0x11   : > { %p2357_p9 = pneg %p2979_p8  ;;  %s172_s29 = sshll.u32 %s2893_s28, 4  ;;  %s2994_s29 = int_to_ptr.vmem [resolvable:$true] %s172_s29 }
  0x12   : > { %s2718_s5 = scalar_lea.hbm %s3589_s1, 6144 }
  0x13   : > { %p2990_p11 = pnand %p2357_p9, %p2959_p1  ;;  %p2719_p12 = scmp.ne.s32.totalorder %s3589_s1, %s2718_s5 }
  0x14   : > { %p2725_p5 = scmp.lt.u32.totalorder %s2718_s5, %s3589_s1 }
  0x15   : > { %p2720_p13 = pneg %p2990_p11 }
  0x17   : > { %p2721_p0 = pnand %p2720_p13, %p2719_p12 }
  0x19   : > { %p2722_p3 = pneg %p2721_p0 }
  0x1b   : > { %p2727_p7 = pnand %p2725_p5, %p2722_p3 }
  0x1d   : > { %2730 = shalt.err (!%p2727_p7)
}
  0x1e   : > { %s2731_s10 = scalar_lea.vmem %s2983_s26, 6144  ;;  %p2739_p1 = scmp.lt.s32.totalorder %s2983_s26, %s2983_s26 }
  0x1f   : > { %p2732_p9 = scmp.ne.s32.totalorder %s2983_s26, %s2731_s10  ;;  %p2740_p12 = scmp.lt.s32.totalorder %s2731_s10, %s2731_s10 }
  0x21   : > { %p2734_p10 = pnand %p2732_p9, %p2720_p13  ;;  %p2741_p0 = por %p2740_p12, %p2739_p1 }
  0x23   : > { %p2735_p6 = pneg %p2734_p10 }
  0x25   : > { %p2742_p4 = pnand %p2741_p0, %p2735_p6 }
  0x27   : > { %2745 = shalt.err (!%p2742_p4)
}
  0x28   : > { %s2894_s11 = smov 192   ;;  %s2895_s18 = smov 12  }
  0x29   : > { %2360 = dma.hbm_to_vmem [thread:$0]  (!%p2990_p11), %s3589_s1, 6144, %s2983_s26, [#allocation6], %s2894_s11, %s2894_s11, %s2895_s18  }
  0x2a   : > { %s2746_s4 = scalar_lea.hbm %s3590_s2, 3072 }
  0x2b   : > { %p2747_p1 = scmp.ne.s32.totalorder %s3590_s2, %s2746_s4  ;;  %p2753_p10 = scmp.lt.u32.totalorder %s2746_s4, %s3590_s2 }
  0x2d   : > { %p2749_p4 = pnand %p2747_p1, %p2720_p13 }
  0x2f   : > { %p2750_p6 = pneg %p2749_p4 }
  0x31   : > { %p2755_p3 = pnand %p2753_p10, %p2750_p6 }
  0x33   : > { %2758 = shalt.err (!%p2755_p3)
}
  0x34   : > { %s2759_s26 = scalar_lea.vmem %s2994_s29, 3072  ;;  %p2767_p12 = scmp.lt.s32.totalorder %s2994_s29, %s2994_s29 }
  0x35   : > { %p2760_p5 = scmp.ne.s32.totalorder %s2994_s29, %s2759_s26  ;;  %p2768_p0 = scmp.lt.s32.totalorder %s2759_s26, %s2759_s26 }
  0x37   : > { %p2762_p7 = pnand %p2760_p5, %p2720_p13  ;;  %p2769_p1 = por %p2768_p0, %p2767_p12 }
  0x39   : > { %p2763_p9 = pneg %p2762_p7 }
  0x3b   : > { %p2770_p4 = pnand %p2769_p1, %p2763_p9 }
  0x3d   : > { %2773 = shalt.err (!%p2770_p4)
}
  0x3e   : > { %s2896_s9 = smov 64   ;;  %s2897_s10 = smov 4  }
  0x3f   : > { %2363 = dma.hbm_to_vmem [thread:$0]  (!%p2990_p11), %s3590_s2, 3072, %s2994_s29, [#allocation6], %s2896_s9, %s2896_s9, %s2897_s10  }
  0x40   : > { %s32_s19 = sadd.s32 1, %s2886_s16  ;;  %s39_s25 = sadd.s32 1, %s2878_s14 }
  0x41   : > { %p34_p13 = scmp.ge.s32.totalorder %s32_s19, 2  ;;  %p46_p6 = scmp.ne.s32.totalorder %s2878_s14, %s2874_s13 }
  0x42   : > { %p47_p10 = scmp.eq.s32.totalorder %s2890_s17, 0  ;;  %p2374_p3 = scmp.lt.s32.totalorder %s2890_s17, 2 }
  0x43   : > { %s3646_s19 = smov (%p34_p13, %s32_s19), 0  ;;  %p3058_p7 = por %p2963_p2, %p46_p6 }
  0x44   : > { %p48_p5 = por %p47_p10, %p46_p6  ;;  %s36_s27 = ssub.s32 %s2886_s16, %s3646_s19 }
  0x45   : > { %s3612_s28 = scalar_select %p3058_p7, 1, 0 }
  0x46   : > { %s186_s30 = sand.u32 1, %s2878_s14   ;;  %p37_p9 = scmp.eq.s32.totalorder %s36_s27, 0 }
  0x47   : > { %s2002_s29 = sshll.u32 %s186_s30, 7  ;;  %s2135_s4 = sshll.u32 %s2886_s16, 11 }
  0x48   : > { %s3067_s5 = scalar_select %p37_p9, %s2878_s14, %s39_s25  }
  0x49   : > { %s3072_s8 = scalar_lea.hbm %s3588_s0, %s2135_s4  ;;  %s190_s21 = scalar_lea.vmem [#allocation2], %s2002_s29 }
  0x4a   : > { %s197_s26 = sshll.u32 %s190_s21, 4  ;;  %p3076_p2 = pnand %p2374_p3, %p48_p5  ;;  %s3080_s26 = int_to_ptr.vmem [resolvable:$true] %s197_s26 }
  0x4b   : > { %s3082_s10 = scalar_lea.sflag [#allocation3], %s186_s30  ;;  %s2774_s11 = scalar_lea.hbm %s3072_s8, 2048 }
  0x4c   : > { %p2775_p11 = scmp.ne.s32.totalorder %s3072_s8, %s2774_s11  ;;  %p2776_p12 = pneg %p3076_p2 }
  0x4d   : > { %s2779_s27 = scalar_lea.hbm %s3588_s0, 4096  ;;  %p2780_p4 = scmp.lt.u32.totalorder %s3072_s8, %s3588_s0 }
  0x4e   : > { %p2777_p0 = pnand %p2776_p12, %p2775_p11  ;;  %p2781_p13 = scmp.lt.u32.totalorder %s2779_s27, %s2774_s11 }
  0x4f   : > { %p2783_p10 = scmp.lt.u32.totalorder %s2774_s11, %s3072_s8 }
  0x50   : > { %p2778_p1 = pneg %p2777_p0  ;;  %p2782_p6 = por %p2781_p13, %p2780_p4 }
  0x52   : > { %p2784_p3 = por %p2783_p10, %p2782_p6 }
  0x54   : > { %p2785_p5 = pnand %p2784_p3, %p2778_p1 }
  0x56   : > { %2788 = shalt.err (!%p2785_p5)
}
  0x57   : > { %s2789_s30 = scalar_lea.vmem %s3080_s26, 2048  ;;  %s2898_s6 = smov [#allocation2]  }
  0x58   : > { %p2790_p9 = scmp.ne.s32.totalorder %s3080_s26, %s2789_s30  ;;  %s2794_s7 = sshll.u32 %s2898_s6, 4  ;;  %s2795_s7 = int_to_ptr.vmem [resolvable:$false] %s2794_s7 }
  0x59   : > { %s2796_s21 = scalar_lea.vmem %s2795_s7, 4096  ;;  %p2797_p7 = scmp.lt.s32.totalorder %s3080_s26, %s2795_s7 }
  0x5a   : > { %p2792_p11 = pnand %p2790_p9, %p2776_p12  ;;  %p2798_p4 = scmp.lt.s32.totalorder %s2796_s21, %s2789_s30 }
  0x5c   : > { %p2793_p0 = pneg %p2792_p11  ;;  %p2799_p13 = por %p2798_p4, %p2797_p7 }
  0x5e   : > { %p2800_p6 = pnand %p2799_p13, %p2793_p0 }
  0x60   : > { %2803 = shalt.err (!%p2800_p6)
}
  0x61   : > { %s2899_s11 = smov 128   ;;  %s2900_s18 = smov 8  }
  0x62   : > { %2367 = dma.hbm_to_vmem [thread:$0]  (!%p3076_p2), %s3072_s8, 2048, %s3080_s26, %s3082_s10, %s2899_s11, %s2899_s11, %s2900_s18  }
  0x63   : > { %209 = sbr.rel (%p2979_p8) target bundleno = 722 (0x2d2), region = 32 }
  0x6a   : > { %s3113_s25 = sand.u32 1, %s2874_s13   ;;  %p3614_p7 = scmp.ne.s32.totalorder %s3608_s22, 0 }
  0x6b   : > { %s2006_s27 = sshll.u32 %s3113_s25, 7  ;;  %s212_s29 = scalar_lea.sflag [#allocation3], %s3113_s25 }
  0x6c   : > { %s3119_s4 = scalar_lea.vmem [#allocation2], %s2006_s27 }
  0x6d   : > { %2857 = dma.done.wait (%p3614_p7), %s212_s29, 2048  }
  0x6e   : > { %2859 = vsyncadd (%p3614_p7), %s212_s29, 4294965248  ;;  %p3615_p2 = scmp.ne.s32.totalorder %s3606_s20, 0 }
  0x70   : > { %2861 = dma.done.wait (%p3615_p2), [#allocation6], 9216  }
  0x71   : > { %2863 = vsyncadd (%p3615_p2), [#allocation6], 4294958080  ;;  %v2901_v0 = vmov 0   ;;  %v2438_v1 = vld [vmem:[#allocation5 + $0x4] ss:$12 sps:$4 sm:$0xff]   ;;  %v272_v20 = vld [vmem:[%s3119_s4 + $0x8] sm:$0xff] }
  0x72   : > { %487 = vmatprep.mubr.bf16.mxu0 %v2901_v0  ;;  %v2440_v2 = vld [vmem:[#allocation5 + $0x8] ss:$12 sps:$4 sm:$0xff]   ;;  %455 = vmatprep.subr.bf16.mxu0 %v2438_v1  ;;  %v2441_v3 = vld [vmem:[#allocation5] ss:$12 sps:$4 sm:$0xff]   ;;  %v2445_v6 = vld [vmem:[#allocation5 + $0x18] ss:$12 sps:$4 sm:$0xff]  }
  0x73   : > { %2249 = vmatprep.subr.bf16.mxu1 %v2440_v2  ;;  %v2442_v4 = vld [vmem:[#allocation5 + $0x1c] ss:$12 sps:$4 sm:$0xff]   ;;  %456 = vmatpush1.bf16.msra.mxu0 %v2441_v3  ;;  %v2444_v5 = vld [vmem:[#allocation5 + $0x20] ss:$12 sps:$4 sm:$0xff]   ;;  %v2448_v8 = vld [vmem:[#allocation5 + $0x38] ss:$12 sps:$4 sm:$0xff]  }
  0x74   : > { %2250 = vmatpush3.bf16.msra.mxu1 %v2440_v2  ;;  %457 = vmatprep.subr.bf16.mxu0 %v2442_v4  ;;  %v2446_v7 = vld [vmem:[#allocation5 + $0x34] ss:$12 sps:$4 sm:$0xff]   ;;  %v2449_v9 = vld [vmem:[#allocation5 + $0x30] ss:$12 sps:$4 sm:$0xff]   ;;  %v2450_v10 = vld [vmem:[#allocation5 + $0x4c] ss:$12 sps:$4 sm:$0xff]  }
  0x75   : > { %2251 = vmatprep.subr.bf16.mxu1 %v2444_v5  ;;  %v2452_v11 = vld [vmem:[#allocation5 + $0x50] ss:$12 sps:$4 sm:$0xff]   ;;  %v2453_v12 = vld [vmem:[#allocation5 + $0x48] ss:$12 sps:$4 sm:$0xff]   ;;  %v2457_v15 = vld [vmem:[#allocation5 + $0x60] ss:$12 sps:$4 sm:$0xff]  }
  0x76   : > { %v2454_v13 = vld [vmem:[#allocation5 + $0x64] ss:$12 sps:$4 sm:$0xff]   ;;  %v2456_v14 = vld [vmem:[#allocation5 + $0x68] ss:$12 sps:$4 sm:$0xff]   ;;  %v2460_v17 = vld [vmem:[#allocation5 + $0x80] ss:$12 sps:$4 sm:$0xff]  }
  0x77   : > { %458 = vmatpush1.bf16.msra.mxu0 %v2445_v6  ;;  %v2458_v16 = vld [vmem:[#allocation5 + $0x7c] ss:$12 sps:$4 sm:$0xff]   ;;  %v271_v18 = vld [vmem:[%s3119_s4] sm:$0xff]  ;;  %v2466_v25 = vld [vmem:[#allocation5 + $0xac] ss:$12 sps:$4 sm:$0xff]   ;;  %s3514_s20 = scalar_lea.vmem [#allocation8], %s2006_s27 }
  0x78   : > { %2252 = vmatpush3.bf16.msra.mxu1 %v2444_v5  ;;  %459 = vmatprep.subr.bf16.mxu0 %v2446_v7  ;;  %v2461_v19 = vld [vmem:[#allocation5 + $0x78] ss:$12 sps:$4 sm:$0xff]   ;;  %v2462_v21 = vld [vmem:[#allocation5 + $0x94] ss:$12 sps:$4 sm:$0xff]   ;;  %v3132_v22 = vpack.c.bf16 %v272_v20, %v271_v18  ;;  %v2465_v24 = vld [vmem:[#allocation5 + $0x90] ss:$12 sps:$4 sm:$0xff]  }
  0x79   : > { %2253 = vmatprep.subr.bf16.mxu1 %v2448_v8  ;;  %v2464_v23 = vld [vmem:[#allocation5 + $0x98] ss:$12 sps:$4 sm:$0xff]   ;;  %v2468_v26 = vld [vmem:[#allocation5 + $0xb0] ss:$12 sps:$4 sm:$0xff]   ;;  %v2469_v27 = vld [vmem:[#allocation5 + $0xa8] ss:$12 sps:$4 sm:$0xff]  }
  0x7a   : > { %2265 = vmatprep.mubr.bf16.mxu1 %v3132_v22  ;;  %v273_v28 = vld [vmem:[%s3119_s4 + $0x10] sm:$0xff]  ;;  %v274_v29 = vld [vmem:[%s3119_s4 + $0x18] sm:$0xff]  ;;  %v275_v32 = vld [vmem:[%s3119_s4 + $0x20] sm:$0xff]  ;;  %s2136_s22 = sshll.u32 %s2882_s15, 11  ;;  %s1892_s24 = sshll.u32 %s3514_s20, 4  ;;  %s3537_s24 = int_to_ptr.vmem [resolvable:$true] %s1892_s24 }
  0x7b   : > { %460 = vmatpush1.bf16.msra.mxu0 %v2449_v9  ;;  %v2472_v30 = vld [vmem:[#allocation5 + $0xc4] ss:$12 sps:$4 sm:$0xff]   ;;  %v2473_v31 = vld [vmem:[#allocation5 + $0xc8] ss:$12 sps:$4 sm:$0xff]   ;;  %v3138_v33 = vpack.c.bf16 %v274_v29, %v273_v28  ;;  %v2470_v35 = vld [vmem:[#allocation5 + $0xc0] ss:$12 sps:$4 sm:$0xff]   ;;  %s3535_s9 = scalar_lea.hbm %s3591_s3, %s2136_s22 }
  0x7c   : > { %2254 = vmatpush3.bf16.msra.mxu1 %v2448_v8  ;;  %461 = vmatprep.subr.bf16.mxu0 %v2450_v10  ;;  %v276_v34 = vld [vmem:[%s3119_s4 + $0x28] sm:$0xff]  ;;  %v2474_v37 = vld [vmem:[#allocation5 + $0xd8] ss:$12 sps:$4 sm:$0xff]   ;;  %v277_v39 = vld [vmem:[%s3119_s4 + $0x30] sm:$0xff]  ;;  %s1879_s10 = scalar_lea.sflag [#allocation4], %s3113_s25  ;;  %s2804_s30 = scalar_lea.vmem %s3537_s24, 2048 }
  0x7d   : > { %2255 = vmatprep.subr.bf16.mxu1 %v2452_v11  ;;  %v2476_v36 = vld [vmem:[#allocation5 + $0xdc] ss:$12 sps:$4 sm:$0xff]   ;;  %v3141_v38 = vpack.c.bf16 %v276_v34, %v275_v32  ;;  %v2480_v40 = vld [vmem:[#allocation5 + $0xe0] ss:$12 sps:$4 sm:$0xff]   ;;  %v2487_v43 = vld [vmem:[#allocation5 + $0xf8] ss:$12 sps:$4 sm:$0xff]   ;;  %p2805_p8 = scmp.ne.s32.totalorder %s3537_s24, %s2804_s30 }
  0x7e   : > { %v278_v41 = vld [vmem:[%s3119_s4 + $0x38] sm:$0xff]  ;;  %v2479_v42 = vld [vmem:[#allocation5 + $0xf4] ss:$12 sps:$4 sm:$0xff]   ;;  %v280_v45 = vld [vmem:[%s3119_s4 + $0x48] sm:$0xff]  ;;  %p3637_p12 = scmp.ne.s32.totalorder %s3612_s28, 0  ;;  %s2902_s15 = smov [#allocation8]  }
  0x7f   : > { %462 = vmatpush1.bf16.msra.mxu0 %v2453_v12  ;;  %v279_v44 = vld [vmem:[%s3119_s4 + $0x40] sm:$0xff]  ;;  %v3151_v46 = vpack.c.bf16 %v278_v41, %v277_v39  ;;  %v2477_v47 = vld [vmem:[#allocation5 + $0xf0] ss:$12 sps:$4 sm:$0xff]   ;;  %v2483_v48 = vld [vmem:[#allocation5 + $0x10c] ss:$12 sps:$4 sm:$0xff]   ;;  %s2808_s6 = sshll.u32 %s2902_s15, 4  ;;  %s2809_s6 = int_to_ptr.vmem [resolvable:$false] %s2808_s6 }
  0x80   : > { %2256 = vmatpush3.bf16.msra.mxu1 %v2452_v11  ;;  %463 = vmatprep.subr.bf16.mxu0 %v2454_v13  ;;  %v3153_v49 = vpack.c.bf16 %v280_v45, %v279_v44  ;;  %v2481_v50 = vld [vmem:[#allocation5 + $0x108] ss:$12 sps:$4 sm:$0xff]   ;;  %v282_v52 = vld [vmem:[%s3119_s4 + $0x58] sm:$0xff]  ;;  %v2486_v54 = vld [vmem:[#allocation5 + $0x124] ss:$12 sps:$4 sm:$0xff]   ;;  %p2806_p1 = pnand %p2805_p8, %p3637_p12  ;;  %s2810_s7 = scalar_lea.vmem %s2809_s6, 4096 }
  0x81   : > { %2257 = vmatprep.subr.bf16.mxu1 %v2456_v14  ;;  %v281_v51 = vld [vmem:[%s3119_s4 + $0x50] sm:$0xff]  ;;  %v283_v55 = vld [vmem:[%s3119_s4 + $0x60] sm:$0xff]  ;;  %v284_v56 = vld [vmem:[%s3119_s4 + $0x68] sm:$0xff]  ;;  %p2811_p3 = scmp.lt.s32.totalorder %s3537_s24, %s2809_s6  ;;  %p2812_p5 = scmp.lt.s32.totalorder %s2810_s7, %s2804_s30 }
  0x82   : > { %v2494_v53 = vld [vmem:[#allocation5 + $0x110] ss:$12 sps:$4 sm:$0xff]   ;;  %v2484_v57 = vld [vmem:[#allocation5 + $0x120] ss:$12 sps:$4 sm:$0xff]   ;;  %v3163_v58 = vpack.c.bf16 %v282_v52, %v281_v51  ;;  %v2498_v60 = vld [vmem:[#allocation5 + $0x128] ss:$12 sps:$4 sm:$0xff]   ;;  %v293_v61 = vpack.c.bf16 %v284_v56, %v283_v55  ;;  %p2807_p10 = pneg %p2806_p1 }
  0x83   : > { %464 = vmatpush1.bf16.msra.mxu0 %v2457_v15  ;;  %v2490_v59 = vld [vmem:[#allocation5 + $0x13c] ss:$12 sps:$4 sm:$0xff]   ;;  %v2488_v62 = vld [vmem:[#allocation5 + $0x138] ss:$12 sps:$4 sm:$0xff]   ;;  %v285_v63 = vld [vmem:[%s3119_s4 + $0x70] sm:$0xff]  ;;  %p2813_p9 = por %p2812_p5, %p2811_p3 }
  0x84   : > { %2258 = vmatpush3.bf16.msra.mxu1 %v2456_v14  ;;  %465 = vmatprep.subr.bf16.mxu0 %v2458_v16  ;;  %v286_v1 = vld [vmem:[%s3119_s4 + $0x78] sm:$0xff]  ;;  %v2499_v2 = vld [vmem:[#allocation5 + $0x140] ss:$12 sps:$4 sm:$0xff]   ;;  %v2495_v8 = vld [vmem:[#allocation5 + $0x168] ss:$12 sps:$4 sm:$0xff]  }
  0x85   : > { %2259 = vmatprep.subr.bf16.mxu1 %v2460_v17  ;;  %v2493_v3 = vld [vmem:[#allocation5 + $0x154] ss:$12 sps:$4 sm:$0xff]   ;;  %v2491_v4 = vld [vmem:[#allocation5 + $0x150] ss:$12 sps:$4 sm:$0xff]   ;;  %v294_v5 = vpack.c.bf16 %v286_v1, %v285_v63  ;;  %v2497_v6 = vld [vmem:[#allocation5 + $0x16c] ss:$12 sps:$4 sm:$0xff]   ;;  %p2814_p11 = pnand %p2813_p9, %p2807_p10 }
  0x86   : > { %v2500_v7 = vld [vmem:[#allocation5 + $0x158] ss:$12 sps:$4 sm:$0xff]   ;;  %v2501_v9 = vld [vmem:[#allocation5 + $0x170] ss:$12 sps:$4 sm:$0xff]   ;;  %v2505_v12 = vld [vmem:[#allocation7 + $0x48] sm:$0xff]  }
  0x87   : > { %466 = vmatpush1.bf16.msra.mxu0 %v2461_v19  ;;  %v2502_v10 = vld [vmem:[#allocation7 + $0x40] sm:$0xff]   ;;  %v2506_v13 = vld [vmem:[#allocation7 + $0x8] sm:$0xff]   ;;  %v2507_v14 = vld [vmem:[#allocation7 + $0x50] sm:$0xff]  }
  0x88   : > { %2260 = vmatpush3.bf16.msra.mxu1 %v2460_v17  ;;  %467 = vmatprep.subr.bf16.mxu0 %v2462_v21  ;;  %v2503_v11 = vld [vmem:[#allocation7] sm:$0xff]   ;;  %v2508_v15 = vld [vmem:[#allocation7 + $0x10] sm:$0xff]   ;;  %v2510_v16 = vld [vmem:[#allocation7 + $0x58] sm:$0xff]  }
  0x89   : > { %2261 = vmatprep.subr.bf16.mxu1 %v2464_v23  ;;  %v2511_v17 = vld [vmem:[#allocation7 + $0x18] sm:$0xff]   ;;  %v2513_v18 = vld [vmem:[#allocation7 + $0x20] sm:$0xff]   ;;  %v2515_v20 = vld [vmem:[#allocation7 + $0x68] sm:$0xff]  }
  0x8a   : > { %v2504_v19 = vld [vmem:[#allocation7 + $0x80] sm:$0xff]   ;;  %v2516_v21 = vld [vmem:[#allocation7 + $0x28] sm:$0xff]   ;;  %v2519_v28 = vld [vmem:[#allocation7 + $0x98] sm:$0xff]  }
  0x8b   : > { %468 = vmatpush1.bf16.msra.mxu0 %v2465_v24  ;;  %v2518_v24 = vld [vmem:[#allocation7 + $0x30] sm:$0xff]   ;;  %v2522_v29 = vld [vmem:[#allocation7 + $0xa0] sm:$0xff]   ;;  %v2525_v32 = vld [vmem:[#allocation7 + $0xb8] sm:$0xff]  }
  0x8c   : > { %2262 = vmatpush3.bf16.msra.mxu1 %v2464_v23  ;;  %469 = vmatprep.subr.bf16.mxu0 %v2466_v25  ;;  %v2517_v23 = vld [vmem:[#allocation7 + $0x70] sm:$0xff]   ;;  %v2520_v25 = vld [vmem:[#allocation7 + $0x78] sm:$0xff]  }
  0x8d   : > { %2263 = vmatprep.subr.bf16.mxu1 %v2468_v26 }
  0x8f   : > { %470 = vmatpush1.bf16.msra.mxu0 %v2469_v27  ;;  %v2514_v27 = vld [vmem:[#allocation7 + $0x90] sm:$0xff]  }
  0x90   : > { %2264 = vmatpush3.bf16.msra.mxu1 %v2468_v26  ;;  %2281 = vmatprep.subr.bf16.mxu0 %v2473_v31  ;;  %v2521_v26 = vld [vmem:[#allocation7 + $0x38] sm:$0xff]  }
  0x91   : > { %826 = vmatprep.subr.bf16.mxu1 %v2472_v30  ;;  %v2523_v30 = vld [vmem:[#allocation7 + $0xa8] sm:$0xff]  }
  0x92   : > { %488 = vmatmul.mubr.bf16.vlgmr.msra.gmra.mrb[0].mxu0 %v3132_v22 }
  0x93   : > { %2266 = vmatmul.mubr.bf16.vlgmr.msra.gmra.mrb[0].mxu1 %v3138_v33  ;;  %2282 = vmatpush3.bf16.msra.mxu0 %v2473_v31  ;;  %v2524_v31 = vld [vmem:[#allocation7 + $0xb0] sm:$0xff]  }
  0x94   : > { %827 = vmatpush1.bf16.msra.mxu1 %v2470_v35  ;;  %497 = vmatprep.mubr.bf16.mxu0 %v2901_v0 }
  0x95   : > { %828 = vmatprep.subr.bf16.mxu1 %v2476_v36  ;;  %2269 = vmatprep.mubr.bf16.mxu1 %v3141_v38 }
  0x96   : > { %2283 = vmatprep.subr.bf16.mxu0 %v2480_v40 }
  0x97   : > { %2284 = vmatpush3.bf16.msra.mxu0 %v2480_v40 }
  0x98   : > { %829 = vmatpush1.bf16.msra.mxu1 %v2474_v37  ;;  %2285 = vmatprep.subr.bf16.mxu0 %v2487_v43 }
  0x99   : > { %830 = vmatprep.subr.bf16.mxu1 %v2479_v42 }
  0x9a   : > { %498 = vmatmul.mubr.bf16.gmra.mrb[4].mxu0 %v3138_v33 }
  0x9b   : > { %2270 = vmatmul.mubr.bf16.gmra.mrb[4].mxu1 %v3151_v46  ;;  %507 = vmatprep.mubr.bf16.mxu0 %v2901_v0 }
  0x9c   : > { %831 = vmatpush1.bf16.msra.mxu1 %v2477_v47  ;;  %2273 = vmatprep.mubr.bf16.mxu1 %v3153_v49 }
  0x9d   : > { %832 = vmatprep.subr.bf16.mxu1 %v2483_v48  ;;  %2286 = vmatpush3.bf16.msra.mxu0 %v2487_v43 }
  0x9e   : > { %2287 = vmatprep.subr.bf16.mxu0 %v2494_v53 }
  0xa0   : > { %833 = vmatpush1.bf16.msra.mxu1 %v2481_v50 }
  0xa1   : > { %834 = vmatprep.subr.bf16.mxu1 %v2486_v54  ;;  %2288 = vmatpush3.bf16.msra.mxu0 %v2494_v53 }
  0xa2   : > { %508 = vmatmul.mubr.bf16.gmra.mrb[8].mxu0 %v3141_v38  ;;  %2289 = vmatprep.subr.bf16.mxu0 %v2498_v60 }
  0xa3   : > { %2274 = vmatmul.mubr.bf16.gmra.mrb[8].mxu1 %v3163_v58  ;;  %517 = vmatprep.mubr.bf16.mxu0 %v2901_v0 }
  0xa4   : > { %835 = vmatpush1.bf16.msra.mxu1 %v2484_v57  ;;  %2277 = vmatprep.mubr.bf16.mxu1 %v293_v61 }
  0xa5   : > { %836 = vmatprep.subr.bf16.mxu1 %v2490_v59  ;;  %2290 = vmatpush3.bf16.msra.mxu0 %v2498_v60 }
  0xa6   : > { %2291 = vmatprep.subr.bf16.mxu0 %v2499_v2 }
  0xa8   : > { %837 = vmatpush1.bf16.msra.mxu1 %v2488_v62 }
  0xa9   : > { %838 = vmatprep.subr.bf16.mxu1 %v2493_v3  ;;  %2292 = vmatpush3.bf16.msra.mxu0 %v2499_v2 }
  0xaa   : > { %518 = vmatmul.mubr.bf16.gmra.mrb[12].mxu0 %v3151_v46  ;;  %2293 = vmatprep.subr.bf16.mxu0 %v2500_v7 }
  0xab   : > { %2278 = vmatmul.mubr.bf16.gmra.mrb[12].mxu1 %v294_v5  ;;  %527 = vmatprep.mubr.bf16.mxu0 %v2901_v0 }
  0xac   : > { %839 = vmatpush1.bf16.msra.mxu1 %v2491_v4  ;;  %858 = vmatprep.mubr.bf16.mxu1 %v2901_v0 }
  0xad   : > { %840 = vmatprep.subr.bf16.mxu1 %v2497_v6  ;;  %2294 = vmatpush3.bf16.msra.mxu0 %v2500_v7 }
  0xae   : > { %2295 = vmatprep.subr.bf16.mxu0 %v2501_v9 }
  0xb0   : > { %841 = vmatpush1.bf16.msra.mxu1 %v2495_v8 }
  0xb1   : > { %2296 = vmatpush3.bf16.msra.mxu0 %v2501_v9  ;;  %2313 = vmatprep.subr.bf16.mxu1 %v2504_v19 }
  0xb2   : > { %528 = vmatmul.mubr.bf16.gmra.mrb[16].mxu0 %v3153_v49  ;;  %2169 = vmatprep.subr.bf16.mxu0 %v2502_v10 }
  0xb3   : > { %859 = vmatmul.mubr.bf16.vlgmr.msra.gmra.mrb[16].mxu1 %v3132_v22  ;;  %537 = vmatprep.mubr.bf16.mxu0 %v2901_v0 }
  0xb4   : > { %868 = vmatprep.mubr.bf16.mxu1 %v2901_v0  ;;  %2314 = vmatpush3.bf16.msra.mxu1 %v2504_v19 }
  0xba   : > { %538 = vmatmul.mubr.bf16.gmra.mrb[20].mxu0 %v3163_v58 }
  0xbb   : > { %869 = vmatmul.mubr.bf16.gmra.mrb[20].mxu1 %v3138_v33  ;;  %547 = vmatprep.mubr.bf16.mxu0 %v2901_v0 }
  0xbc   : > { %878 = vmatprep.mubr.bf16.mxu1 %v2901_v0 }
  0xc2   : > { %548 = vmatmul.mubr.bf16.gmra.mrb[24].mxu0 %v293_v61 }
  0xc3   : > { %879 = vmatmul.mubr.bf16.gmra.mrb[24].mxu1 %v3141_v38  ;;  %557 = vmatprep.mubr.bf16.mxu0 %v2901_v0 }
  0xc4   : > { %888 = vmatprep.mubr.bf16.mxu1 %v2901_v0 }
  0xca   : > { %558 = vmatmul.mubr.bf16.gmra.mrb[28].mxu0 %v294_v5 }
  0xcb   : > { %889 = vmatmul.mubr.bf16.gmra.mrb[28].mxu1 %v3151_v46  ;;  %2297 = vmatprep.mubr.bf16.mxu0 %v3132_v22  ;;  %v2509_v22 = vld [vmem:[#allocation7 + $0x88] sm:$0xff]  }
  0xcc   : > { %898 = vmatprep.mubr.bf16.mxu1 %v2901_v0  ;;  %2315 = vmatprep.subr.bf16.mxu1 %v2509_v22 }
  0xcd   : > { %2316 = vmatpush3.bf16.msra.mxu1 %v2509_v22 }
  0xce   : > { %2317 = vmatprep.subr.bf16.mxu1 %v2514_v27 }
  0xd1   : > { %2318 = vmatpush3.bf16.msra.mxu1 %v2514_v27 }
  0xd2   : > { %2298 = vmatmul.mubr.bf16.vlgmr.msra.gmra.mrb[32].mxu0 %v3138_v33  ;;  %2319 = vmatprep.subr.bf16.mxu1 %v2519_v28 }
  0xd3   : > { %899 = vmatmul.mubr.bf16.gmra.mrb[32].mxu1 %v3153_v49  ;;  %2301 = vmatprep.mubr.bf16.mxu0 %v3141_v38 }
  0xd4   : > { %908 = vmatprep.mubr.bf16.mxu1 %v2901_v0  ;;  %2170 = vmatpush3.bf16.msra.mxu0 %v2503_v11 }
  0xd5   : > { %2171 = vmatprep.subr.bf16.mxu0 %v2505_v12  ;;  %2320 = vmatpush3.bf16.msra.mxu1 %v2519_v28 }
  0xd6   : > { %2321 = vmatprep.subr.bf16.mxu1 %v2522_v29 }
  0xd8   : > { %2172 = vmatpush3.bf16.msra.mxu0 %v2506_v13 }
  0xd9   : > { %2173 = vmatprep.subr.bf16.mxu0 %v2507_v14  ;;  %2322 = vmatpush3.bf16.msra.mxu1 %v2522_v29 }
  0xda   : > { %2302 = vmatmul.mubr.bf16.gmra.mrb[36].mxu0 %v3151_v46  ;;  %2323 = vmatprep.subr.bf16.mxu1 %v2523_v30 }
  0xdb   : > { %909 = vmatmul.mubr.bf16.gmra.mrb[36].mxu1 %v3163_v58  ;;  %2305 = vmatprep.mubr.bf16.mxu0 %v3153_v49 }
  0xdc   : > { %918 = vmatprep.mubr.bf16.mxu1 %v2901_v0  ;;  %2174 = vmatpush3.bf16.msra.mxu0 %v2508_v15 }
  0xdd   : > { %2175 = vmatprep.subr.bf16.mxu0 %v2510_v16  ;;  %2324 = vmatpush3.bf16.msra.mxu1 %v2523_v30 }
  0xde   : > { %2325 = vmatprep.subr.bf16.mxu1 %v2524_v31 }
  0xe0   : > { %2176 = vmatpush3.bf16.msra.mxu0 %v2511_v17 }
  0xe1   : > { %2326 = vmatpush3.bf16.msra.mxu1 %v2524_v31 }
  0xe2   : > { %2306 = vmatmul.mubr.bf16.gmra.mrb[40].mxu0 %v3163_v58  ;;  %2327 = vmatprep.subr.bf16.mxu1 %v2525_v32 }
  0xe3   : > { %919 = vmatmul.mubr.bf16.gmra.mrb[40].mxu1 %v293_v61  ;;  %2309 = vmatprep.mubr.bf16.mxu0 %v293_v61 }
  0xe4   : > { %928 = vmatprep.mubr.bf16.mxu1 %v2901_v0  ;;  %v2512_v0 = vld [vmem:[#allocation7 + $0x60] sm:$0xff]  }
  0xe5   : > { %2177 = vmatprep.subr.bf16.mxu0 %v2512_v0  ;;  %2328 = vmatpush3.bf16.msra.mxu1 %v2525_v32 }
  0xe6   : > { %2178 = vmatpush3.bf16.msra.mxu0 %v2513_v18 }
  0xe7   : > { %2179 = vmatprep.subr.bf16.mxu0 %v2515_v20 }
  0xea   : > { %2310 = vmatmul.mubr.bf16.gmra.mrb[44].mxu0 %v294_v5 }
  0xeb   : > { %929 = vmatmul.mubr.bf16.gmra.mrb[44].mxu1 %v294_v5  ;;  %2180 = vmatpush3.bf16.msra.mxu0 %v2516_v21 }
  0xec   : > { %2181 = vmatprep.subr.bf16.mxu0 %v2517_v23 }
  0xef   : > { %2182 = vmatpush3.bf16.msra.mxu0 %v2518_v24 }
  0xf0   : > { %2183 = vmatprep.subr.bf16.mxu0 %v2520_v25 }
  0xf3   : > { %2184 = vmatpush3.bf16.msra.mxu0 %v2521_v26 }
 0x165   : > { %v3197_v33 = vpop.f32.mrb[0].mxu0 }
 0x166   : > { %v3199_v34 = vpop.f32.mrb[0].mxu1  ;;  %v2058_v35 = vmul.f32 -1.442695, %v3197_v33  ;;  %v3203_v37 = vpop.f32.mrb[1].mxu0 }
 0x167   : > { %v2066_v36 = vmul.f32 -1.442695, %v3199_v34  ;;  %v3205_v38 = vpop.f32.mrb[1].mxu1  ;;  %v2059_v39 = vmul.f32 -1.442695, %v3203_v37  ;;  %v3209_v41 = vpop.f32.mrb[2].mxu0 }
 0x168   : > { %v2060_v40 = vmul.f32 -1.442695, %v3205_v38  ;;  %v3211_v42 = vpop.f32.mrb[2].mxu1  ;;  %2526 = vpow2.f32 %v2058_v35  ;;  %v2061_v43 = vmul.f32 -1.442695, %v3209_v41  ;;  %v3214_v44 = vpop.f32.mrb[3].mxu0 }
 0x169   : > { %v3216_v45 = vpop.f32.mrb[3].mxu1  ;;  %2528 = vpow2.f32 %v2066_v36  ;;  %v2069_v46 = vmul.f32 -1.442695, %v3211_v42  ;;  %v2062_v47 = vmul.f32 -1.442695, %v3214_v44 }
 0x16a   : > { %2530 = vpow2.f32 %v2059_v39  ;;  %v2063_v48 = vmul.f32 -1.442695, %v3216_v45 }
 0x16b   : > { %2532 = vpow2.f32 %v2060_v40 }
 0x16c   : > { %2534 = vpow2.f32 %v2061_v43 }
 0x16d   : > { %2536 = vpow2.f32 %v2069_v46  ;;  %v3221_v49 = vpop.f32.mrb[4].mxu0 }
 0x16e   : > { %v3223_v50 = vpop.f32.mrb[4].mxu1  ;;  %2538 = vpow2.f32 %v2062_v47  ;;  %v2064_v51 = vmul.f32 -1.442695, %v3221_v49  ;;  %v3227_v53 = vpop.f32.mrb[5].mxu0 }
 0x16f   : > { %v2078_v52 = vmul.f32 -1.442695, %v3223_v50  ;;  %v3229_v54 = vpop.f32.mrb[5].mxu1  ;;  %2540 = vpow2.f32 %v2063_v48  ;;  %v2065_v55 = vmul.f32 -1.442695, %v3227_v53  ;;  %v3233_v57 = vpop.f32.mrb[6].mxu0 }
 0x170   : > { %v2072_v56 = vmul.f32 -1.442695, %v3229_v54  ;;  %v3235_v58 = vpop.f32.mrb[6].mxu1  ;;  %2542 = vpow2.f32 %v2064_v51  ;;  %v2067_v59 = vmul.f32 -1.442695, %v3233_v57  ;;  %v3238_v60 = vpop.f32.mrb[7].mxu0 }
 0x171   : > { %v3240_v61 = vpop.f32.mrb[7].mxu1  ;;  %2544 = vpow2.f32 %v2078_v52  ;;  %v2081_v35 = vmul.f32 -1.442695, %v3235_v58  ;;  %v2068_v43 = vmul.f32 -1.442695, %v3238_v60 }
 0x172   : > { %v2527_v62 = vpop.eup %2526  ;;  %2546 = vpow2.f32 %v2065_v55  ;;  %v2075_v51 = vmul.f32 -1.442695, %v3240_v61 }
 0x173   : > { %v2529_v63 = vpop.eup %2528  ;;  %v1180_v1 = vadd.f32 1.0, %v2527_v62  ;;  %2548 = vpow2.f32 %v2072_v56 }
 0x174   : > { %v2531_v2 = vpop.eup %2530  ;;  %v1188_v3 = vadd.f32 1.0, %v2529_v63  ;;  %2550 = vpow2.f32 %v2067_v59 }
 0x175   : > { %v2533_v4 = vpop.eup %2532  ;;  %2552 = vrcp.f32 %v1180_v1  ;;  %v1181_v5 = vadd.f32 1.0, %v2531_v2  ;;  %v3242_v6 = vpop.f32.mrb[8].mxu0 }
 0x176   : > { %v3244_v7 = vpop.f32.mrb[8].mxu1  ;;  %v2535_v8 = vpop.eup %2534  ;;  %2554 = vrcp.f32 %v1188_v3  ;;  %v1182_v9 = vadd.f32 1.0, %v2533_v4  ;;  %v2070_v59 = vmul.f32 -1.442695, %v3242_v6 }
 0x177   : > { %v3246_v10 = vpop.f32.mrb[9].mxu0  ;;  %v2537_v11 = vpop.eup %2536  ;;  %2556 = vrcp.f32 %v1181_v5  ;;  %v1183_v12 = vadd.f32 1.0, %v2535_v8  ;;  %v2090_v1 = vmul.f32 -1.442695, %v3244_v7 }
 0x178   : > { %v3248_v13 = vpop.f32.mrb[9].mxu1  ;;  %v3250_v14 = vpop.f32.mrb[10].mxu0  ;;  %2558 = vrcp.f32 %v1182_v9  ;;  %v1191_v16 = vadd.f32 1.0, %v2537_v11  ;;  %v2071_v3 = vmul.f32 -1.442695, %v3246_v10 }
 0x179   : > { %v2539_v15 = vpop.eup %2538  ;;  %v3252_v17 = vpop.f32.mrb[10].mxu1  ;;  %2560 = vrcp.f32 %v1183_v12  ;;  %v2084_v8 = vmul.f32 -1.442695, %v3248_v13  ;;  %v2073_v12 = vmul.f32 -1.442695, %v3250_v14 }
 0x17a   : > { %3616 = vst [vmem:[#allocation12_spill] sm:$0xff] %v3252_v17  ;;  %v2541_v0 = vpop.eup %2540  ;;  %v1184_v18 = vadd.f32 1.0, %v2539_v15  ;;  %v3254_v19 = vpop.f32.mrb[11].mxu0  ;;  %2562 = vrcp.f32 %v1191_v16 }
 0x17b   : > { %v3256_v20 = vpop.f32.mrb[11].mxu1  ;;  %v2543_v21 = vpop.eup %2542  ;;  %v1185_v22 = vadd.f32 1.0, %v2541_v0 }
 0x17c   : > { %3617 = vst [vmem:[#allocation13_spill] sm:$0xff] %v3256_v20  ;;  %v2545_v23 = vpop.eup %2544  ;;  %2564 = vrcp.f32 %v1184_v18  ;;  %v1186_v24 = vadd.f32 1.0, %v2543_v21  ;;  %v2093_v21 = vmul.f32 -1.442695, %v3252_v17 }
 0x17d   : > { %v2547_v25 = vpop.eup %2546  ;;  %2566 = vrcp.f32 %v1185_v22  ;;  %v1200_v26 = vadd.f32 1.0, %v2545_v23  ;;  %v3258_v29 = vpop.f32.mrb[12].mxu0 }
 0x17e   : > { %v2549_v27 = vpop.eup %2548  ;;  %2568 = vrcp.f32 %v1186_v24  ;;  %v1187_v28 = vadd.f32 1.0, %v2547_v25  ;;  %v3260_v30 = vpop.f32.mrb[12].mxu1  ;;  %v2074_v25 = vmul.f32 -1.442695, %v3254_v19 }
 0x17f   : > { %3618 = vst [vmem:[#allocation14_spill] sm:$0xff] %v3260_v30  ;;  %v2551_v31 = vpop.eup %2550  ;;  %2570 = vrcp.f32 %v1200_v26  ;;  %v1194_v32 = vadd.f32 1.0, %v2549_v27  ;;  %v3263_v36 = vpop.f32.mrb[13].mxu0 }
 0x180   : > { %v2553_v39 = vpop.eup %2552  ;;  %2572 = vrcp.f32 %v1187_v28  ;;  %v1189_v40 = vadd.f32 1.0, %v2551_v31  ;;  %v3266_v46 = vpop.f32.mrb[13].mxu1 }
 0x181   : > { %3619 = vst [vmem:[#allocation15_spill] sm:$0xff] %v3266_v46  ;;  %v3268_v47 = vpop.f32.mrb[14].mxu0  ;;  %v3270_v48 = vpop.eup %2554  ;;  %2574 = vrcp.f32 %v1194_v32  ;;  %v1324_v5 = vmul.f32 %v2553_v39, %v3197_v33 }
 0x182   : > { %3620 = vst [vmem:[#allocation16_spill] sm:$0xff] %v3268_v47  ;;  %v3273_v52 = vpop.f32.mrb[14].mxu1  ;;  %v3275_v55 = vpop.f32.mrb[15].mxu0  ;;  %2576 = vrcp.f32 %v1189_v40 }
 0x183   : > { %3621 = vst [vmem:[#allocation17_spill] sm:$0xff] %v3273_v52  ;;  %3622 = vst [vmem:[#allocation18_spill] sm:$0xff] %v3275_v55  ;;  %v2557_v56 = vpop.eup %2556  ;;  %v3278_v62 = vpop.f32.mrb[15].mxu1  ;;  %2578 = vpow2.f32 %v2081_v35 }
 0x184   : > { %3623 = vst [vmem:[#allocation19_spill] sm:$0xff] %v3278_v62  ;;  %v3280_v63 = vpop.eup %2558  ;;  %2580 = vpow2.f32 %v2068_v43  ;;  %v1325_v11 = vmul.f32 %v2557_v56, %v3203_v37  ;;  %v2102_v56 = vmul.f32 -1.442695, %v3260_v30  ;;  %v2080_v30 = vmul.f32 -1.442695, %v3275_v55 }
 0x185   : > { %v2561_v2 = vpop.eup %2560  ;;  %2582 = vpow2.f32 %v2075_v51  ;;  %v3290_v15 = vpop.f32.mrb[16].mxu0 }
 0x186   : > { %v3284_v4 = vpop.eup %2562  ;;  %2584 = vpow2.f32 %v2070_v59  ;;  %3624 = vst [vmem:[#allocation20_spill] sm:$0xff] %v3290_v15  ;;  %v860_v16 = vpop.f32.mrb[16].mxu1  ;;  %v1327_v18 = vmul.f32 %v2561_v2, %v3209_v41  ;;  %v2087_v41 = vmul.f32 -1.442695, %v3256_v20 }
 0x187   : > { %v2565_v9 = vpop.eup %2564  ;;  %2586 = vpow2.f32 %v2090_v1  ;;  %v1372_v33 = vmul.f32 %v1324_v5, %v860_v16  ;;  %v3296_v22 = vpop.f32.mrb[17].mxu0 }
 0x188   : > { %v3292_v0 = vpop.eup %2566  ;;  %3625 = vst [vmem:[#allocation21_spill] sm:$0xff] %v3296_v22  ;;  %v862_v23 = vpop.f32.mrb[17].mxu1  ;;  %v1328_v37 = vmul.f32 %v2565_v9, %v3214_v44  ;;  %2588 = vpow2.f32 %v2071_v3  ;;  %v2076_v44 = vmul.f32 -1.442695, %v3258_v29 }
 0x189   : > { %v2569_v24 = vpop.eup %2568  ;;  %v1373_v26 = vmul.f32 %v1325_v11, %v862_v23  ;;  %v3300_v27 = vpop.f32.mrb[18].mxu0  ;;  %2590 = vpow2.f32 %v2084_v8 }
 0x18a   : > { %v864_v28 = vpop.f32.mrb[18].mxu1  ;;  %v3302_v31 = vpop.eup %2570  ;;  %2592 = vpow2.f32 %v2073_v12  ;;  %v1330_v5 = vmul.f32 %v2569_v24, %v3221_v49 }
 0x18b   : > { %v1375_v32 = vmul.f32 %v1327_v18, %v864_v28  ;;  %v3305_v35 = vpop.f32.mrb[19].mxu0  ;;  %v866_v39 = vpop.f32.mrb[19].mxu1  ;;  %2594 = vpow2.f32 %v2093_v21 }
 0x18c   : > { %v2573_v40 = vpop.eup %2572  ;;  %v1376_v43 = vmul.f32 %v1328_v37, %v866_v39  ;;  %2596 = vpow2.f32 %v2074_v25 }
 0x18d   : > { %v3308_v51 = vpop.eup %2574  ;;  %v1436_v59 = vpack.c.bf16 %v1375_v32, %v1372_v33  ;;  %2598 = vpow2.f32 %v2087_v41  ;;  %v1331_v9 = vmul.f32 %v2573_v40, %v3227_v53  ;;  %v3313_v12 = vpop.f32.mrb[20].mxu0 }
 0x18e   : > { %v2577_v1 = vpop.eup %2576  ;;  %v1437_v2 = vpack.c.bf16 %v1376_v43, %v1373_v26  ;;  %2600 = vpow2.f32 %v2076_v44  ;;  %v870_v16 = vpop.f32.mrb[20].mxu1 }
 0x18f   : > { %v2579_v3 = vpop.eup %2578  ;;  %v1333_v21 = vmul.f32 %v2577_v1, %v3233_v57  ;;  %2602 = vpow2.f32 %v2102_v56  ;;  %v3316_v23 = vmul.f32 %v1330_v5, %v870_v16  ;;  %v3318_v37 = vpop.f32.mrb[21].mxu0 }
 0x190   : > { %v2581_v8 = vpop.eup %2580  ;;  %v1203_v11 = vadd.f32 1.0, %v2579_v3  ;;  %1684 = vmatprep.mubr.bf16.mxu0 %v1437_v2  ;;  %v872_v49 = vpop.f32.mrb[21].mxu1 }
 0x191   : > { %v2583_v18 = vpop.eup %2582  ;;  %v1190_v33 = vadd.f32 1.0, %v2581_v8  ;;  %1685 = vmatmul.mubr.bf16.vlgmr.msra.gmra.mrb[48].mxu0 %v1436_v59  ;;  %v3320_v25 = vmul.f32 %v1331_v9, %v872_v49  ;;  %v3322_v26 = vpop.f32.mrb[22].mxu0 }
 0x192   : > { %v2585_v24 = vpop.eup %2584  ;;  %2604 = vrcp.f32 %v1203_v11  ;;  %v1197_v53 = vadd.f32 1.0, %v2583_v18  ;;  %v874_v28 = vpop.f32.mrb[22].mxu1 }
 0x193   : > { %v2587_v41 = vpop.eup %2586  ;;  %2606 = vrcp.f32 %v1190_v33  ;;  %v1192_v32 = vadd.f32 1.0, %v2585_v24  ;;  %v3324_v57 = vmul.f32 %v1333_v21, %v874_v28  ;;  %v3326_v39 = vpop.f32.mrb[23].mxu0 }
 0x194   : > { %v876_v40 = vpop.f32.mrb[23].mxu1  ;;  %v2589_v44 = vpop.eup %2588  ;;  %2608 = vrcp.f32 %v1197_v53  ;;  %v1212_v43 = vadd.f32 1.0, %v2587_v41 }
 0x195   : > { %v2591_v56 = vpop.eup %2590  ;;  %2610 = vrcp.f32 %v1192_v32  ;;  %v1193_v59 = vadd.f32 1.0, %v2589_v44  ;;  %v3330_v16 = vpop.f32.mrb[24].mxu0 }
 0x196   : > { %v2593_v2 = vpop.eup %2592  ;;  %2612 = vrcp.f32 %v1212_v43  ;;  %v1206_v3 = vadd.f32 1.0, %v2591_v56  ;;  %v880_v18 = vpop.f32.mrb[24].mxu1  ;;  %v2077_v56 = vmul.f32 -1.442695, %v3263_v36 }
 0x197   : > { %v2595_v5 = vpop.eup %2594  ;;  %2614 = vrcp.f32 %v1193_v59  ;;  %v1195_v8 = vadd.f32 1.0, %v2593_v2  ;;  %v3332_v49 = vpop.f32.mrb[25].mxu0 }
 0x198   : > { %v2597_v9 = vpop.eup %2596  ;;  %2616 = vrcp.f32 %v1206_v3  ;;  %v1215_v11 = vadd.f32 1.0, %v2595_v5  ;;  %v882_v24 = vpop.f32.mrb[25].mxu1 }
 0x199   : > { %v2599_v21 = vpop.eup %2598  ;;  %2618 = vrcp.f32 %v1195_v8  ;;  %v1196_v33 = vadd.f32 1.0, %v2597_v9  ;;  %v3334_v41 = vpop.f32.mrb[26].mxu0  ;;  %v2096_v8 = vmul.f32 -1.442695, %v3266_v46 }
 0x19a   : > { %v2601_v53 = vpop.eup %2600  ;;  %2620 = vrcp.f32 %v1215_v11  ;;  %v1209_v28 = vadd.f32 1.0, %v2599_v21  ;;  %v884_v32 = vpop.f32.mrb[26].mxu1  ;;  %v2079_v11 = vmul.f32 -1.442695, %v3268_v47 }
 0x19b   : > { %v2603_v44 = vpop.eup %2602  ;;  %2622 = vrcp.f32 %v1196_v33  ;;  %v1198_v43 = vadd.f32 1.0, %v2601_v53  ;;  %v3337_v59 = vpop.f32.mrb[27].mxu0  ;;  %v2105_v53 = vmul.f32 -1.442695, %v3273_v52 }
 0x19c   : > { %v3339_v2 = vpop.f32.mrb[27].mxu1  ;;  %v3341_v3 = vpop.eup %2604  ;;  %2624 = vrcp.f32 %v1209_v28  ;;  %v1224_v5 = vadd.f32 1.0, %v2603_v44  ;;  %v2099_v44 = vmul.f32 -1.442695, %v3278_v62  ;;  %v2085_v62 = vmul.f32 -1.442695, %v3300_v27 }
 0x19d   : > { %v2607_v9 = vpop.eup %2606  ;;  %2626 = vrcp.f32 %v1198_v43  ;;  %v3354_v46 = vpop.f32.mrb[28].mxu0 }
 0x19e   : > { %v3345_v21 = vpop.eup %2608  ;;  %v1334_v33 = vmul.f32 %v2607_v9, %v3238_v60  ;;  %2628 = vrcp.f32 %v1224_v5  ;;  %v890_v47 = vpop.f32.mrb[28].mxu1  ;;  %v2082_v60 = vmul.f32 -1.442695, %v3290_v15  ;;  %v2083_v5 = vmul.f32 -1.442695, %v3296_v22 }
 0x19f   : > { %v2611_v1 = vpop.eup %2610  ;;  %2630 = vpow2.f32 %v2077_v56  ;;  %v3358_v56 = vpop.f32.mrb[29].mxu0 }
 0x1a0   : > { %v3350_v20 = vpop.eup %2612  ;;  %v1336_v28 = vmul.f32 %v2611_v1, %v3242_v6  ;;  %2632 = vpow2.f32 %v2096_v8  ;;  %v1382_v43 = vmul.f32 %v1334_v33, %v876_v40  ;;  %v3360_v9 = vpop.f32.mrb[29].mxu1 }
 0x1a1   : > { %v2615_v17 = vpop.eup %2614  ;;  %2634 = vpow2.f32 %v2079_v11  ;;  %v3368_v8 = vpop.f32.mrb[30].mxu0 }
 0x1a2   : > { %v3362_v52 = vpop.eup %2616  ;;  %v1337_v6 = vmul.f32 %v2615_v17, %v3246_v10  ;;  %2636 = vpow2.f32 %v2105_v53  ;;  %v1440_v40 = vpack.c.bf16 %v1382_v43, %v3320_v25  ;;  %v3366_v1 = vmul.f32 %v1336_v28, %v880_v18  ;;  %v3370_v11 = vpop.f32.mrb[30].mxu1 }
 0x1a3   : > { %v2619_v33 = vpop.eup %2618  ;;  %2638 = vpow2.f32 %v2080_v30  ;;  %v3373_v22 = vpop.f32.mrb[31].mxu0  ;;  %v2086_v17 = vmul.f32 -1.442695, %v3305_v35  ;;  %v2088_v53 = vmul.f32 -1.442695, %v3313_v12  ;;  %v3626_v30 = vpack.c.bf16 %v3324_v57, %v3316_v23 }
 0x1a4   : > { %v3375_v15 = vpop.f32.mrb[31].mxu1  ;;  %v3377_v55 = vpop.eup %2620  ;;  %v1339_v10 = vmul.f32 %v2619_v33, %v3250_v14  ;;  %2640 = vpow2.f32 %v2099_v44  ;;  %1692 = vmatprep.mubr.bf16.mxu0 %v1440_v40  ;;  %v1385_v25 = vmul.f32 %v1337_v6, %v882_v24  ;;  %v2089_v14 = vmul.f32 -1.442695, %v3318_v37 }
 0x1a5   : > { %v2623_v18 = vpop.eup %2622  ;;  %2642 = vpow2.f32 %v2082_v60  ;;  %1693 = vmatmul.mubr.bf16.gmra.mrb[52].mxu0 %v3626_v30  ;;  %v1332_v24 = vmul.f32 %v3270_v48, %v3199_v34  ;;  %v1326_v60 = vmul.f32 %v3280_v63, %v3205_v38  ;;  %v2091_v6 = vmul.f32 -1.442695, %v3322_v26  ;;  %v2299_v40 = vpop.f32.mrb[32].mxu0 }
 0x1a6   : > { %v3385_v28 = vpop.eup %2624  ;;  %v1340_v43 = vmul.f32 %v2623_v18, %v3254_v19  ;;  %2644 = vpow2.f32 %v2083_v5  ;;  %v1387_v44 = vmul.f32 %v1339_v10, %v884_v32  ;;  %v3399_v32 = vpop.f32.mrb[32].mxu1  ;;  %v1335_v34 = vmul.f32 %v3284_v4, %v3211_v42 }
 0x1a7   : > { %v2627_v33 = vpop.eup %2626  ;;  %2646 = vpow2.f32 %v2085_v62  ;;  %v1329_v38 = vmul.f32 %v3292_v0, %v3216_v45  ;;  %v1380_v48 = vmul.f32 %v2299_v40, %v1332_v24  ;;  %v3405_v62 = vpop.f32.mrb[33].mxu1 }
 0x1a8   : > { %v3394_v23 = vpop.eup %2628  ;;  %v1342_v57 = vmul.f32 %v2627_v33, %v3258_v29  ;;  %2648 = vpow2.f32 %v2086_v17  ;;  %v1442_v19 = vpack.c.bf16 %v1387_v44, %v3366_v1  ;;  %v1388_v5 = vmul.f32 %v1340_v43, %v3339_v2  ;;  %v973_v29 = vpop.f32.mrb[33].mxu0 }
 0x1a9   : > { %v2631_v10 = vpop.eup %2630  ;;  %2650 = vpow2.f32 %v2088_v53  ;;  %v3409_v18 = vpop.f32.mrb[34].mxu1  ;;  %v1374_v42 = vmul.f32 %v1326_v60, %v973_v29  ;;  %v1344_v60 = vmul.f32 %v3302_v31, %v3223_v50  ;;  %v1347_v50 = vmul.f32 %v3341_v3, %v3235_v58 }
 0x1aa   : > { %v2633_v63 = vpop.eup %2632  ;;  %v1199_v17 = vadd.f32 1.0, %v2631_v10  ;;  %2652 = vpow2.f32 %v2089_v14  ;;  %v1443_v1 = vpack.c.bf16 %v1388_v5, %v1385_v25  ;;  %v3407_v2 = vmul.f32 %v1342_v57, %v890_v47  ;;  %v2300_v30 = vpop.f32.mrb[34].mxu0 }
 0x1ab   : > { %v2635_v43 = vpop.eup %2634  ;;  %v1218_v44 = vadd.f32 1.0, %v2633_v63  ;;  %2654 = vpow2.f32 %v2091_v6  ;;  %v1383_v4 = vmul.f32 %v2300_v30, %v1335_v34  ;;  %v3411_v45 = vpop.f32.mrb[35].mxu1  ;;  %v2092_v34 = vmul.f32 -1.442695, %v3326_v39 }
 0x1ac   : > { %v976_v0 = vpop.f32.mrb[35].mxu0  ;;  %v2637_v53 = vpop.eup %2636  ;;  %2656 = vrcp.f32 %v1199_v17  ;;  %v1201_v33 = vadd.f32 1.0, %v2635_v43  ;;  %1700 = vmatprep.mubr.bf16.mxu0 %v1443_v1  ;;  %v2095_v3 = vmul.f32 -1.442695, %v3332_v49 }
 0x1ad   : > { %v1377_v24 = vmul.f32 %v1329_v38, %v976_v0  ;;  %v2639_v14 = vpop.eup %2638  ;;  %2658 = vrcp.f32 %v1218_v44  ;;  %v1227_v47 = vadd.f32 1.0, %v2637_v53  ;;  %1701 = vmatmul.mubr.bf16.gmra.mrb[56].mxu0 %v1442_v19  ;;  %v1441_v25 = vpack.c.bf16 %v1383_v4, %v1380_v48  ;;  %v2303_v17 = vpop.f32.mrb[36].mxu0 }
 0x1ae   : > { %v2641_v57 = vpop.eup %2640  ;;  %2660 = vrcp.f32 %v1201_v33  ;;  %v1202_v5 = vadd.f32 1.0, %v2639_v14  ;;  %v1338_v38 = vmul.f32 %v3308_v51, %v3229_v54  ;;  %v3419_v19 = vmul.f32 -1.442695, %v3330_v16  ;;  %v3421_v48 = vpop.f32.mrb[36].mxu1 }
 0x1af   : > { %v1438_v40 = vpack.c.bf16 %v1377_v24, %v1374_v42  ;;  %v2643_v6 = vpop.eup %2642  ;;  %2662 = vrcp.f32 %v1227_v47  ;;  %v1221_v10 = vadd.f32 1.0, %v2641_v57  ;;  %v1392_v30 = vmul.f32 %v2303_v17, %v1344_v60  ;;  %v3425_v43 = vpop.f32.mrb[37].mxu1 }
 0x1b0   : > { %v2645_v29 = vpop.eup %2644  ;;  %2664 = vrcp.f32 %v1202_v5  ;;  %v1204_v63 = vadd.f32 1.0, %v2643_v6  ;;  %v989_v44 = vpop.f32.mrb[37].mxu0  ;;  %v1341_v51 = vmul.f32 %v3345_v21, %v3240_v61  ;;  %v2097_v61 = vmul.f32 -1.442695, %v3334_v41 }
 0x1b1   : > { %2329 = vmatprep.mubr.bf16.mxu1 %v1438_v40  ;;  %v2647_v1 = vpop.eup %2646  ;;  %2666 = vrcp.f32 %v1221_v10  ;;  %v1205_v31 = vadd.f32 1.0, %v2645_v29  ;;  %v1386_v4 = vmul.f32 %v1338_v38, %v989_v44  ;;  %v3429_v0 = vpop.f32.mrb[38].mxu1  ;;  %v2098_v6 = vmul.f32 -1.442695, %v3337_v59 }
 0x1b2   : > { %2330 = vmatmul.mubr.bf16.vlgmr.msra.gmra.mrb[48].mxu1 %v1441_v25  ;;  %v2649_v54 = vpop.eup %2648  ;;  %2668 = vrcp.f32 %v1204_v63  ;;  %v1207_v42 = vadd.f32 1.0, %v2647_v1  ;;  %v2304_v53 = vpop.f32.mrb[38].mxu0  ;;  %v1356_v29 = vmul.f32 %v3350_v20, %v3244_v7  ;;  %v1350_v1 = vmul.f32 %v3362_v52, %v3248_v13  ;;  %v3628_v13 = vld [vmem:[#allocation16_spill] sm:$0xff] }
 0x1b3   : > { %v2651_v33 = vpop.eup %2650  ;;  %2670 = vrcp.f32 %v1205_v31  ;;  %v1208_v58 = vadd.f32 1.0, %v2649_v54  ;;  %v1395_v24 = vmul.f32 %v2304_v53, %v1347_v50  ;;  %v3432_v14 = vpop.f32.mrb[39].mxu1  ;;  %v2100_v31 = vmul.f32 -1.442695, %v3354_v46  ;;  %v3627_v54 = vld [vmem:[#allocation12_spill] sm:$0xff] }
 0x1b4   : > { %v992_v47 = vpop.f32.mrb[39].mxu0  ;;  %v2653_v25 = vpop.eup %2652  ;;  %2672 = vrcp.f32 %v1207_v42  ;;  %v1210_v57 = vadd.f32 1.0, %v2651_v33  ;;  %v2103_v7 = vmul.f32 -1.442695, %v3368_v8 }
 0x1b5   : > { %v1389_v21 = vmul.f32 %v1341_v51, %v992_v47  ;;  %v2655_v5 = vpop.eup %2654  ;;  %2674 = vrcp.f32 %v1208_v58  ;;  %v1211_v40 = vadd.f32 1.0, %v2653_v25  ;;  %v1447_v60 = vpack.c.bf16 %v1395_v24, %v1392_v30  ;;  %v2307_v42 = vpop.f32.mrb[40].mxu0  ;;  %v3629_v24 = vld [vmem:[#allocation13_spill] sm:$0xff] }
 0x1b6   : > { %v2657_v10 = vpop.eup %2656  ;;  %2676 = vrcp.f32 %v1210_v57  ;;  %v1213_v38 = vadd.f32 1.0, %v2655_v5  ;;  %v1359_v30 = vmul.f32 %v3377_v55, %v3627_v54  ;;  %v2101_v51 = vmul.f32 -1.442695, %v3358_v56  ;;  %v3446_v20 = vpop.f32.mrb[40].mxu1 }
 0x1b7   : > { %v1444_v63 = vpack.c.bf16 %v1389_v21, %v1386_v4  ;;  %v2659_v17 = vpop.eup %2658  ;;  %v1343_v50 = vmul.f32 %v2657_v10, %v3263_v36  ;;  %2678 = vrcp.f32 %v1211_v40  ;;  %v1404_v53 = vmul.f32 %v2307_v42, %v1356_v29  ;;  %v3450_v33 = vpop.f32.mrb[41].mxu1  ;;  %v3630_v40 = vld [vmem:[#allocation18_spill] sm:$0xff]  ;;  %v3633_v42 = vld [vmem:[#allocation20_spill] sm:$0xff] }
 0x1b8   : > { %v2661_v44 = vpop.eup %2660  ;;  %2680 = vrcp.f32 %v1213_v38  ;;  %v1005_v58 = vpop.f32.mrb[41].mxu0  ;;  %v1353_v47 = vmul.f32 %v3385_v28, %v3629_v24  ;;  %v2104_v25 = vmul.f32 -1.442695, %v3373_v22  ;;  %v3631_v28 = vld [vmem:[#allocation14_spill] sm:$0xff] }
 0x1b9   : > { %2333 = vmatprep.mubr.bf16.mxu1 %v1444_v63  ;;  %v2663_v4 = vpop.eup %2662  ;;  %v1345_v52 = vmul.f32 %v2661_v44, %v3628_v13  ;;  %2682 = vpow2.f32 %v2092_v34  ;;  %v1391_v36 = vmul.f32 %v1343_v50, %v3360_v9  ;;  %v1398_v57 = vmul.f32 %v1350_v1, %v1005_v58  ;;  %v3456_v21 = vpop.f32.mrb[42].mxu1  ;;  %v3632_v50 = vld [vmem:[#allocation15_spill] sm:$0xff] }
 0x1ba   : > { %2334 = vmatmul.mubr.bf16.gmra.mrb[52].mxu1 %v1447_v60  ;;  %v2665_v55 = vpop.eup %2664  ;;  %2684 = vpow2.f32 %v3419_v19  ;;  %v2308_v5 = vpop.f32.mrb[42].mxu0  ;;  %v1368_v19 = vmul.f32 %v3394_v23, %v3631_v28  ;;  %v1362_v44 = vmul.f32 %v2659_v17, %v3632_v50 }
 0x1bb   : > { %v2667_v34 = vpop.eup %2666  ;;  %v1346_v9 = vmul.f32 %v2665_v55, %v3630_v40  ;;  %2686 = vpow2.f32 %v2095_v3  ;;  %v1393_v10 = vmul.f32 %v1345_v52, %v3370_v11  ;;  %v1407_v29 = vmul.f32 %v2308_v5, %v1359_v30  ;;  %v3460_v60 = vpop.f32.mrb[43].mxu1  ;;  %v3634_v52 = vld [vmem:[#allocation21_spill] sm:$0xff] }
 0x1bc   : > { %v1008_v38 = vpop.f32.mrb[43].mxu0  ;;  %v2669_v63 = vpop.eup %2668  ;;  %2688 = vpow2.f32 %v2097_v61  ;;  %v3635_v40 = vld [vmem:[#allocation17_spill] sm:$0xff] }
 0x1bd   : > { %v1401_v1 = vmul.f32 %v1353_v47, %v1008_v38  ;;  %v2671_v54 = vpop.eup %2670  ;;  %v1348_v13 = vmul.f32 %v2669_v63, %v3633_v42  ;;  %2690 = vpow2.f32 %v2098_v6  ;;  %v1445_v3 = vpack.c.bf16 %v1393_v10, %v3407_v2 }
 0x1be   : > { %v1394_v11 = vmul.f32 %v1346_v9, %v3375_v15  ;;  %v2673_v30 = vpop.eup %2672  ;;  %v1349_v58 = vmul.f32 %v2671_v54, %v3634_v52  ;;  %2692 = vpow2.f32 %v2100_v31  ;;  %v1453_v55 = vpack.c.bf16 %v1407_v29, %v1404_v53  ;;  %v3474_v9 = vpop.f32.mrb[44].mxu1 }
 0x1bf   : > { %v1450_v24 = vpack.c.bf16 %v1401_v1, %v1398_v57  ;;  %v2675_v5 = vpop.eup %2674  ;;  %v1351_v23 = vmul.f32 %v2673_v30, %v3300_v27  ;;  %2694 = vpow2.f32 %v2101_v51  ;;  %v1396_v17 = vmul.f32 %v1348_v13, %v3399_v32  ;;  %v2311_v31 = vpop.f32.mrb[44].mxu0 }
 0x1c0   : > { %v1446_v61 = vpack.c.bf16 %v1394_v11, %v1391_v36  ;;  %v2677_v47 = vpop.eup %2676  ;;  %v1371_v6 = vmul.f32 %v2663_v4, %v3635_v40  ;;  %v1352_v2 = vmul.f32 %v2675_v5, %v3305_v35  ;;  %2696 = vpow2.f32 %v2103_v7  ;;  %v3478_v51 = vpop.f32.mrb[45].mxu1  ;;  %v3636_v7 = vld [vmem:[#allocation19_spill] sm:$0xff] }
 0x1c1   : > { %v1397_v15 = vmul.f32 %v1349_v58, %v3405_v62  ;;  %2337 = vmatprep.mubr.bf16.mxu1 %v1450_v24  ;;  %v2679_v53 = vpop.eup %2678  ;;  %v1354_v57 = vmul.f32 %v2677_v47, %v3313_v12  ;;  %2698 = vpow2.f32 %v2104_v25  ;;  %v1399_v27 = vmul.f32 %v1351_v23, %v3409_v18  ;;  %v1021_v4 = vpop.f32.mrb[45].mxu0 }
 0x1c2   : > { %1708 = vmatprep.mubr.bf16.mxu0 %v1446_v61  ;;  %v1416_v32 = vmul.f32 %v2311_v31, %v1368_v19  ;;  %2338 = vmatmul.mubr.bf16.gmra.mrb[56].mxu1 %v1453_v55  ;;  %v2681_v35 = vpop.eup %2680  ;;  %v1365_v36 = vmul.f32 %v2667_v34, %v3636_v7  ;;  %v1355_v62 = vmul.f32 %v2679_v53, %v3318_v37  ;;  %v3483_v38 = vpop.f32.mrb[46].mxu1 }
 0x1c3   : > { %1709 = vmatmul.mubr.bf16.gmra.mrb[60].mxu0 %v1445_v3  ;;  %v1400_v10 = vmul.f32 %v1352_v2, %v3411_v45  ;;  %v1410_v29 = vmul.f32 %v1362_v44, %v1021_v4  ;;  %v2312_v12 = vpop.f32.mrb[46].mxu0  ;;  %v2683_v25 = vpop.eup %2682  ;;  %v1357_v18 = vmul.f32 %v2681_v35, %v3322_v26  ;;  %v1448_v63 = vpack.c.bf16 %v1399_v27, %v1396_v17 }
 0x1c4   : > { %v3487_v28 = vmul.f32 %v1354_v57, %v3421_v48  ;;  %v1419_v19 = vmul.f32 %v2312_v12, %v1371_v6  ;;  %v3489_v50 = vpop.f32.mrb[47].mxu1  ;;  %v1024_v34 = vpop.f32.mrb[47].mxu0  ;;  %v1214_v37 = vadd.f32 1.0, %v2683_v25  ;;  %v1403_v45 = vmul.f32 %v1355_v62, %v3425_v43 }
 0x1c5   : > { %v2685_v1 = vpop.eup %2684  ;;  %v1449_v54 = vpack.c.bf16 %v1400_v10, %v1397_v15  ;;  %v1413_v44 = vmul.f32 %v1365_v36, %v1024_v34  ;;  %v1405_v3 = vmul.f32 %v1357_v18, %v3429_v0 }
 0x1c6   : > { %v2687_v42 = vpop.eup %2686  ;;  %v1216_v13 = vadd.f32 1.0, %v2685_v1  ;;  %v1459_v11 = vpack.c.bf16 %v1419_v19, %v1416_v32  ;;  %2700 = vrcp.f32 %v1214_v37 }
 0x1c7   : > { %v2689_v26 = vpop.eup %2688  ;;  %v1217_v30 = vadd.f32 1.0, %v2687_v42  ;;  %1716 = vmatprep.mubr.bf16.mxu0 %v1449_v54  ;;  %v1456_v48 = vpack.c.bf16 %v1413_v44, %v1410_v29  ;;  %v1451_v55 = vpack.c.bf16 %v1405_v3, %v3487_v28 }
 0x1c8   : > { %v2691_v52 = vpop.eup %2690  ;;  %2702 = vrcp.f32 %v1216_v13  ;;  %v1219_v58 = vadd.f32 1.0, %v2689_v26 }
 0x1c9   : > { %v2693_v24 = vpop.eup %2692  ;;  %2704 = vrcp.f32 %v1217_v30  ;;  %v1220_v5 = vadd.f32 1.0, %v2691_v52  ;;  %2341 = vmatprep.mubr.bf16.mxu1 %v1456_v48 }
 0x1ca   : > { %v2695_v43 = vpop.eup %2694  ;;  %2706 = vrcp.f32 %v1219_v58  ;;  %v1222_v23 = vadd.f32 1.0, %v2693_v24  ;;  %2342 = vmatmul.mubr.bf16.gmra.mrb[60].mxu1 %v1459_v11 }
 0x1cb   : > { %v2697_v0 = vpop.eup %2696  ;;  %2708 = vrcp.f32 %v1220_v5  ;;  %v1223_v61 = vadd.f32 1.0, %v2695_v43  ;;  %1717 = vmatmul.mubr.bf16.gmra.mrb[64].mxu0 %v1448_v63 }
 0x1cc   : > { %v2699_v17 = vpop.eup %2698  ;;  %2710 = vrcp.f32 %v1222_v23  ;;  %v1225_v47 = vadd.f32 1.0, %v2697_v0 }
 0x1cd   : > { %2712 = vrcp.f32 %v1223_v61  ;;  %v1226_v40 = vadd.f32 1.0, %v2699_v17 }
 0x1ce   : > { %2714 = vrcp.f32 %v1225_v47 }
 0x1cf   : > { %2716 = vrcp.f32 %v1226_v40 }
 0x1d0   : > { %v2701_v6 = vpop.eup %2700 }
 0x1d1   : > { %v1358_v15 = vmul.f32 %v2701_v6, %v3326_v39 }
 0x1d2   : > { %v2703_v2 = vpop.eup %2702 }
 0x1d3   : > { %v2705_v31 = vpop.eup %2704  ;;  %v1360_v53 = vmul.f32 %v2703_v2, %v3330_v16  ;;  %v1406_v32 = vmul.f32 %v1358_v15, %v3432_v14 }
 0x1d4   : > { %v2707_v57 = vpop.eup %2706  ;;  %v1361_v27 = vmul.f32 %v2705_v31, %v3332_v49 }
 0x1d5   : > { %v2709_v4 = vpop.eup %2708  ;;  %v1363_v35 = vmul.f32 %v2707_v57, %v3334_v41  ;;  %v1408_v7 = vmul.f32 %v1360_v53, %v3446_v20  ;;  %v1452_v10 = vpack.c.bf16 %v1406_v32, %v1403_v45 }
 0x1d6   : > { %v2711_v36 = vpop.eup %2710  ;;  %v1364_v62 = vmul.f32 %v2709_v4, %v3337_v59  ;;  %v1409_v29 = vmul.f32 %v1361_v27, %v3450_v33 }
 0x1d7   : > { %v2713_v39 = vpop.eup %2712  ;;  %v1366_v12 = vmul.f32 %v2711_v36, %v3354_v46  ;;  %v1411_v16 = vmul.f32 %v1363_v35, %v3456_v21  ;;  %1724 = vmatprep.mubr.bf16.mxu0 %v1452_v10 }
 0x1d8   : > { %v2715_v25 = vpop.eup %2714  ;;  %v1367_v49 = vmul.f32 %v2713_v39, %v3358_v56  ;;  %v1412_v14 = vmul.f32 %v1364_v62, %v3460_v60  ;;  %1725 = vmatmul.mubr.bf16.gmra.mrb[68].mxu0 %v1451_v55 }
 0x1d9   : > { %v2717_v41 = vpop.eup %2716  ;;  %v1369_v20 = vmul.f32 %v2715_v25, %v3368_v8  ;;  %v1454_v18 = vpack.c.bf16 %v1411_v16, %v1408_v7  ;;  %v1414_v59 = vmul.f32 %v1366_v12, %v3474_v9 }
 0x1da   : > { %v1370_v33 = vmul.f32 %v2717_v41, %v3373_v22  ;;  %v1455_v63 = vpack.c.bf16 %v1412_v14, %v1409_v29  ;;  %v1415_v46 = vmul.f32 %v1367_v49, %v3478_v51 }
 0x1db   : > { %v1417_v21 = vmul.f32 %v1369_v20, %v3483_v38 }
 0x1dc   : > { %1732 = vmatprep.mubr.bf16.mxu0 %v1455_v63  ;;  %v1418_v56 = vmul.f32 %v1370_v33, %v3489_v50 }
 0x1dd   : > { %v1457_v28 = vpack.c.bf16 %v1417_v21, %v1414_v59 }
 0x1de   : > { %v1458_v19 = vpack.c.bf16 %v1418_v56, %v1415_v46 }
 0x1e0   : > { %1733 = vmatmul.mubr.bf16.gmra.mrb[72].mxu0 %v1454_v18 }
 0x1e1   : > { %1740 = vmatprep.mubr.bf16.mxu0 %v1458_v19 }
 0x1e8   : > { %1741 = vmatmul.mubr.bf16.gmra.mrb[76].mxu0 %v1457_v28 }
 0x264   : > { %v2185_v8 = vpop.f32.mrb[48].mxu0 }
 0x265   : > { %v2186_v60 = vpop.f32.mrb[49].mxu0 }
 0x266   : > { %v2187_v34 = vadd.f32 %v2186_v60, %v2185_v8  ;;  %v2188_v1 = vpop.f32.mrb[50].mxu0 }
 0x267   : > { %v2189_v9 = vpop.f32.mrb[51].mxu0 }
 0x268   : > { %v2190_v37 = vadd.f32 %v2189_v9, %v2188_v1 }
 0x278   : > { %v2191_v22 = vpop.f32.mrb[52].mxu0 }
 0x279   : > { %v2192_v54 = vpop.f32.mrb[53].mxu0 }
 0x27a   : > { %v2193_v45 = vadd.f32 %v2192_v54, %v2191_v22  ;;  %v2194_v51 = vpop.f32.mrb[54].mxu0 }
 0x27b   : > { %v2195_v44 = vpop.f32.mrb[55].mxu0 }
 0x27c   : > { %v2196_v38 = vadd.f32 %v2195_v44, %v2194_v51 }
 0x280   : > { %v2197_v42 = vpop.f32.mrb[56].mxu0 }
 0x281   : > { %v2198_v50 = vpop.f32.mrb[57].mxu0 }
 0x282   : > { %v2199_v13 = vadd.f32 %v2198_v50, %v2197_v42  ;;  %v2200_v3 = vpop.f32.mrb[58].mxu0 }
 0x283   : > { %v2201_v11 = vpop.f32.mrb[59].mxu0 }
 0x284   : > { %v2202_v26 = vadd.f32 %v2201_v11, %v2200_v3 }
 0x285   : > { %v2331_v30 = vpop.f32.mrb[48].mxu1 }
 0x286   : > { %v1792_v48 = vadd.f32 %v2331_v30, %v2193_v45  ;;  %v1783_v52 = vpop.f32.mrb[49].mxu1 }
 0x287   : > { %v1784_v58 = vadd.f32 %v2187_v34, %v1783_v52  ;;  %v2332_v55 = vpop.f32.mrb[50].mxu1 }
 0x288   : > { %v1795_v24 = vadd.f32 %v2332_v55, %v2196_v38  ;;  %v1786_v5 = vpop.f32.mrb[51].mxu1  ;;  %1864 = vst [vmem:[%s3514_s20 + $0x10] sm:$0xff] %v1792_v48 }
 0x289   : > { %v1787_v43 = vadd.f32 %v2190_v37, %v1786_v5  ;;  %1862 = vst [vmem:[%s3514_s20] sm:$0xff] %v1784_v58 }
 0x28a   : > { %1865 = vst [vmem:[%s3514_s20 + $0x18] sm:$0xff] %v1795_v24 }
 0x28b   : > { %1863 = vst [vmem:[%s3514_s20 + $0x8] sm:$0xff] %v1787_v43 }
 0x28d   : > { %v2335_v23 = vpop.f32.mrb[52].mxu1 }
 0x28e   : > { %v1799_v0 = vpop.f32.mrb[53].mxu1 }
 0x28f   : > { %v1800_v61 = vadd.f32 %v2199_v13, %v1799_v0  ;;  %v2336_v17 = vpop.f32.mrb[54].mxu1 }
 0x290   : > { %v1802_v47 = vpop.f32.mrb[55].mxu1 }
 0x291   : > { %v1803_v40 = vadd.f32 %v2202_v26, %v1802_v47  ;;  %1866 = vst [vmem:[%s3514_s20 + $0x20] sm:$0xff] %v1800_v61 }
 0x293   : > { %1867 = vst [vmem:[%s3514_s20 + $0x28] sm:$0xff] %v1803_v40 }
 0x295   : > { %v2339_v6 = vpop.f32.mrb[56].mxu1 }
 0x296   : > { %v2203_v2 = vpop.f32.mrb[60].mxu0  ;;  %v1815_v15 = vpop.f32.mrb[57].mxu1 }
 0x297   : > { %v2204_v31 = vpop.f32.mrb[61].mxu0  ;;  %v2340_v53 = vpop.f32.mrb[58].mxu1 }
 0x298   : > { %v2205_v57 = vadd.f32 %v2204_v31, %v2203_v2  ;;  %v2206_v27 = vpop.f32.mrb[62].mxu0  ;;  %v1818_v32 = vpop.f32.mrb[59].mxu1 }
 0x299   : > { %v2207_v4 = vpop.f32.mrb[63].mxu0 }
 0x29a   : > { %v2208_v35 = vadd.f32 %v2207_v4, %v2206_v27  ;;  %v1808_v7 = vadd.f32 %v2335_v23, %v2205_v57 }
 0x29c   : > { %v1811_v36 = vadd.f32 %v2336_v17, %v2208_v35  ;;  %1868 = vst [vmem:[%s3514_s20 + $0x30] sm:$0xff] %v1808_v7 }
 0x29d   : > { %v2343_v62 = vpop.f32.mrb[60].mxu1 }
 0x29e   : > { %v2209_v10 = vpop.f32.mrb[64].mxu0  ;;  %v1831_v29 = vpop.f32.mrb[61].mxu1  ;;  %1869 = vst [vmem:[%s3514_s20 + $0x38] sm:$0xff] %v1811_v36 }
 0x29f   : > { %v2210_v39 = vpop.f32.mrb[65].mxu0  ;;  %v2344_v12 = vpop.f32.mrb[62].mxu1 }
 0x2a0   : > { %v2211_v16 = vadd.f32 %v2210_v39, %v2209_v10  ;;  %v2212_v25 = vpop.f32.mrb[66].mxu0  ;;  %v1834_v49 = vpop.f32.mrb[63].mxu1 }
 0x2a1   : > { %v2213_v14 = vpop.f32.mrb[67].mxu0 }
 0x2a2   : > { %v2214_v41 = vadd.f32 %v2213_v14, %v2212_v25  ;;  %v1816_v20 = vadd.f32 %v2211_v16, %v1815_v15 }
 0x2a4   : > { %v1819_v18 = vadd.f32 %v2214_v41, %v1818_v32  ;;  %1870 = vst [vmem:[%s3514_s20 + $0x40] sm:$0xff] %v1816_v20 }
 0x2a6   : > { %1871 = vst [vmem:[%s3514_s20 + $0x48] sm:$0xff] %v1819_v18 }
 0x2ab   : > { %v2215_v59 = vpop.f32.mrb[68].mxu0 }
 0x2ac   : > { %v2216_v33 = vpop.f32.mrb[69].mxu0 }
 0x2ad   : > { %v2217_v63 = vadd.f32 %v2216_v33, %v2215_v59  ;;  %v2218_v46 = vpop.f32.mrb[70].mxu0 }
 0x2ae   : > { %v2219_v21 = vpop.f32.mrb[71].mxu0 }
 0x2af   : > { %v2220_v56 = vadd.f32 %v2219_v21, %v2218_v46  ;;  %v1824_v28 = vadd.f32 %v2339_v6, %v2217_v63 }
 0x2b1   : > { %v1827_v19 = vadd.f32 %v2340_v53, %v2220_v56  ;;  %1872 = vst [vmem:[%s3514_s20 + $0x50] sm:$0xff] %v1824_v28 }
 0x2b3   : > { %v2221_v8 = vpop.f32.mrb[72].mxu0  ;;  %1873 = vst [vmem:[%s3514_s20 + $0x58] sm:$0xff] %v1827_v19 }
 0x2b4   : > { %v2222_v60 = vpop.f32.mrb[73].mxu0 }
 0x2b5   : > { %v2223_v34 = vadd.f32 %v2222_v60, %v2221_v8  ;;  %v2224_v1 = vpop.f32.mrb[74].mxu0 }
 0x2b6   : > { %v2225_v9 = vpop.f32.mrb[75].mxu0 }
 0x2b7   : > { %v2226_v37 = vadd.f32 %v2225_v9, %v2224_v1  ;;  %v1832_v22 = vadd.f32 %v2223_v34, %v1831_v29 }
 0x2b9   : > { %v1835_v54 = vadd.f32 %v2226_v37, %v1834_v49  ;;  %1874 = vst [vmem:[%s3514_s20 + $0x60] sm:$0xff] %v1832_v22 }
 0x2bb   : > { %v2227_v45 = vpop.f32.mrb[76].mxu0  ;;  %1875 = vst [vmem:[%s3514_s20 + $0x68] sm:$0xff] %v1835_v54 }
 0x2bc   : > { %v2228_v51 = vpop.f32.mrb[77].mxu0 }
 0x2bd   : > { %v2229_v44 = vadd.f32 %v2228_v51, %v2227_v45  ;;  %v2230_v38 = vpop.f32.mrb[78].mxu0 }
 0x2be   : > { %v2231_v42 = vpop.f32.mrb[79].mxu0 }
 0x2bf   : > { %v1840_v50 = vadd.f32 %v2343_v62, %v2229_v44  ;;  %v2232_v13 = vadd.f32 %v2231_v42, %v2230_v38 }
 0x2c1   : > { %v1843_v3 = vadd.f32 %v2344_v12, %v2232_v13  ;;  %1876 = vst [vmem:[%s3514_s20 + $0x70] sm:$0xff] %v1840_v50 }
 0x2c3   : > { %1877 = vst [vmem:[%s3514_s20 + $0x78] sm:$0xff] %v1843_v3 }
 0x2c4   : > { %2817 = shalt.err (!%p2814_p11)
}
 0x2c5   : > { %s2818_s21 = scalar_lea.hbm %s3535_s9, 2048  ;;  %s2822_s27 = scalar_lea.hbm %s3591_s3, 4096 }
 0x2c6   : > { %p2819_p0 = scmp.ne.s32.totalorder %s3535_s9, %s2818_s21  ;;  %p2823_p6 = scmp.lt.u32.totalorder %s3535_s9, %s3591_s3 }
 0x2c7   : > { %p2824_p7 = scmp.lt.u32.totalorder %s2822_s27, %s2818_s21  ;;  %p2826_p8 = scmp.lt.u32.totalorder %s2818_s21, %s3535_s9 }
 0x2c8   : > { %p2820_p4 = pnand %p2819_p0, %p3637_p12 }
 0x2c9   : > { %p2825_p2 = por %p2824_p7, %p2823_p6 }
 0x2ca   : > { %p2821_p13 = pneg %p2820_p4 }
 0x2cb   : > { %p2827_p1 = por %p2826_p8, %p2825_p2 }
 0x2cd   : > { %p2828_p10 = pnand %p2827_p1, %p2821_p13 }
 0x2cf   : > { %2831 = shalt.err (!%p2828_p10)
}
 0x2d0   : > { %s2903_s20 = smov 128   ;;  %s2904_s22 = smov 8  }
 0x2d1   : > { %2355 = dma.vmem_to_hbm [thread:$0]  (%p3637_p12), %s3537_s24, 2048, %s3535_s9, %s1879_s10, %s2903_s20, %s2903_s20, %s2904_s22  }
 0x2d2 PF: > { %s1907_s8 = sand.u32 1, %s2870_s12   ;;  %p3638_p3 = scmp.ne.s32.totalorder %s3609_s23, 0 }
 0x2d3   : > { %p3639_p5 = scmp.ge.s32.totalorder %s2890_s17, 2  ;;  %s1908_s26 = scalar_lea.sflag [#allocation4], %s1907_s8 }
 0x2d5   : > { %p2369_p9 = pnand %p3639_p5, %p3638_p3 }
 0x2d7   : > { %2865 = dma.done.wait (!%p2369_p9), %s1908_s26, 2048  }
 0x2d8   : > { %2867 = vsyncadd (!%p2369_p9), %s1908_s26, 4294965248  ;;  %s20_s17 = sadd.s32 1, %s2890_s17   ;;  %s3640_s12 = smov %s2874_s13 }
 0x2d9   : > { %p17_p11 = scmp.ge.s32.totalorder %s20_s17, 4   ;;  %s3641_s13 = smov %s2878_s14 }
 0x2da   : > { %s3642_s14 = smov %s3067_s5  ;;  %s3643_s15 = smov %s2886_s16 }
 0x2db   : > { %s3644_s16 = smov %s3646_s19  ;;  %19 = sbr.rel (!%p17_p11) target bundleno = 7 (0x7), region = 92 }
 0x2e2   :  { %1913 = vsyncpa [#allocation3], 1 }
 0x2e3   :  { %1915 = vsyncpa [#allocation3 + $0x1], 1 }
 0x2e4   :  { %1916 = vsyncpa [#allocation6], 1 }
 0x2e5   :  { %1917 = vsyncpa [#allocation4], 1 }
 0x2e6   :  { %1919 = vsyncpa [#allocation4 + $0x1], 1 }

</bundles_post_ra>
